<compile_context>
chip_gen: v7x
topology: tpu7x:2x2x1
jax: 0.10.0
libtpu: 0.0.40
codegen_flags: <defaults>
</compile_context>

<pallas_src>
import math

import jax
import jax.numpy as jnp
from jax import lax
from jax.experimental import pallas as pl
from jax.experimental.pallas import tpu as pltpu

# ----------------------------- config ----------------------------------------
BSZ = 2                      # per-branch batch (module input batch = 2*BSZ)
Q_LEN = 16
NUM_HEADS = 4
NUM_KV_HEADS = 2
HEAD_DIM = 16
HIDDEN = NUM_HEADS * HEAD_DIM          # 64
WINDOW = 8
ROPE_BASE = 10000.0
GROUPS = NUM_HEADS // NUM_KV_HEADS     # 2
QD = NUM_HEADS * HEAD_DIM              # 64  (q columns in fused projection)
KVD = NUM_KV_HEADS * HEAD_DIM          # 32  (k / v columns)
QKV_N = QD + 2 * KVD                   # 128 (lane-dense fused projection width)

# MXU operand dtype.  float32 keeps the tight numerical check at these toy
# shapes (compute is negligible vs. launch overhead).  On v6e/v7x at
# production shapes, set to jnp.bfloat16 (accumulation stays f32 via
# preferred_element_type) for 2-4x MXU throughput; widen tolerances.
MXU_DTYPE = jnp.float32


# --------------------------- in-kernel helpers --------------------------------
def _dot_nn(a, b):
    # a @ b, f32 accumulation on the MXU.
    return jnp.dot(a.astype(MXU_DTYPE), b.astype(MXU_DTYPE),
                   preferred_element_type=jnp.float32)


def _dot_nt(a, b):
    # a @ b.T without materializing the transpose (MXU "nt" form).
    return lax.dot_general(a.astype(MXU_DTYPE), b.astype(MXU_DTYPE),
                           dimension_numbers=(((1,), (1,)), ((), ())),
                           preferred_element_type=jnp.float32)


def _rope_2d(x, cos_b, sin_b):
    # x, cos_b, sin_b: [S, D]
    half = HEAD_DIM // 2
    x_rot = jnp.concatenate([-x[:, half:], x[:, :half]], axis=-1)
    return x * cos_b + x_rot * sin_b


# ------------------------------ fused kernel ----------------------------------
def _duo_attention_kernel(h_ref, wqkv_ref, wo_ref, cos_ref, sin_ref,
                          mask_ref, o_ref):
    # h_ref:    [B*S, HIDDEN]   hidden states of this branch (full or local)
    # wqkv_ref: [HIDDEN, 128]   fused, pre-transposed q|k|v weights
    # wo_ref:   [H*D, HIDDEN]   pre-transposed o_proj weight
    # cos/sin:  [B, S, D]       rotary tables (shared by both branches)
    # mask_ref: [S, S]          additive mask for this branch
    # o_ref:    [B*S, HIDDEN]
    B, S, D = cos_ref.shape
    H, KVH, G = NUM_HEADS, NUM_KV_HEADS, GROUPS
    scale = 1.0 / math.sqrt(D)

    # Fused QKV projection for the whole branch: [B*S, 64] @ [64, 128].
    qkv = _dot_nn(h_ref[...], wqkv_ref[...])          # [B*S, QKV_N] f32
    mask = mask_ref[...]                              # [S, S] additive

    out_rows = []
    for b in range(B):                                # tiny static unroll (B=2)
        r0 = b * S
        cos_b = cos_ref[b]                            # [S, D]
        sin_b = sin_ref[b]

        # RoPE'd K and raw V per shared KV head (GQA without jnp.repeat).
        k_heads, v_heads = [], []
        for n in range(KVH):
            k_raw = qkv[r0:r0 + S, QD + n * D: QD + (n + 1) * D]
            k_heads.append(_rope_2d(k_raw, cos_b, sin_b))
            v_heads.append(qkv[r0:r0 + S, QD + KVD + n * D: QD + KVD + (n + 1) * D])

        head_outs = []
        for h in range(H):                            # static unroll (H=4)
            q_h = _rope_2d(qkv[r0:r0 + S, h * D:(h + 1) * D], cos_b, sin_b)
            k_h = k_heads[h // G]
            v_h = v_heads[h // G]
            scores = _dot_nt(q_h, k_h) * scale + mask          # [S, S]
            m = jnp.max(scores, axis=-1, keepdims=True)
            p = jnp.exp(scores - m)                            # f32 softmax
            attn = p / jnp.sum(p, axis=-1, keepdims=True)
            head_outs.append(_dot_nn(attn, v_h))               # [S, D]
        out_rows.append(jnp.concatenate(head_outs, axis=-1))   # [S, H*D]

    attn_out = jnp.concatenate(out_rows, axis=0)               # [B*S, H*D]
    # Output projection fused into the same kernel.
    o_ref[...] = _dot_nn(attn_out, wo_ref[...])                # [B*S, HIDDEN]


# ------------------------------ host-side glue --------------------------------
def prepare_params(raw_params):
    """One-time prep (outside jit): fuse q/k/v and pre-transpose to [K, N]."""
    wqkv_t = jnp.transpose(jnp.concatenate(
        [raw_params["wq"], raw_params["wk"], raw_params["wv"]], axis=0))  # [HIDDEN, 128]
    wo_t = jnp.transpose(raw_params["wo"])                                # [H*D, HIDDEN]
    return {"wqkv_t": wqkv_t, "wo_t": wo_t}


def rotary_cos_sin(position_ids, head_dim, base=ROPE_BASE):
    # position_ids: [B, S] -> cos/sin: [B, S, head_dim]
    inv_freq = 1.0 / (base ** (jnp.arange(0, head_dim, 2, dtype=jnp.float32) / head_dim))
    freqs = position_ids[..., None].astype(jnp.float32) * inv_freq[None, None, :]
    emb = jnp.concatenate([freqs, freqs], axis=-1)
    return jnp.cos(emb), jnp.sin(emb)


def _build_masks(seq_len, window):
    # [2, S, S] additive masks: index 0 = full (causal), 1 = local (window).
    row = jnp.arange(seq_len)[:, None]
    col = jnp.arange(seq_len)[None, :]
    full_mask = jnp.where(col > row, -jnp.inf, 0.0).astype(jnp.float32)
    w = min(window, seq_len)
    # Matches torch: ones everywhere, -inf strictly older than (i - w + 1); no causal cut.
    local_mask = jnp.where(col >= row - (w - 1), 1.0, -jnp.inf).astype(jnp.float32)
    return jnp.stack([full_mask, local_mask], axis=0)


def duo_attention_forward(params, hidden_states, position_ids):
    bsz2, S, K = hidden_states.shape
    assert bsz2 % 2 == 0
    bsz = bsz2 // 2

    cos, sin = rotary_cos_sin(position_ids, HEAD_DIM)   # [bsz, S, D] (shared)
    masks = _build_masks(S, WINDOW)                     # [2, S, S]  (constant)

    # Branch-major view: [2 (full/local), bsz*S, HIDDEN] -- free metadata reshape.
    h3 = hidden_states.reshape(2, bsz * S, K)

    out = pl.pallas_call(
        _duo_attention_kernel,
        out_shape=jax.ShapeDtypeStruct((2, bsz * S, HIDDEN), jnp.float32),
        grid=(2,),                                       # one step per branch
        in_specs=[
            pl.BlockSpec((None, bsz * S, K), lambda i: (i, 0, 0)),      # hidden
            pl.BlockSpec((HIDDEN, QKV_N), lambda i: (0, 0)),            # wqkv^T
            pl.BlockSpec((QD, HIDDEN), lambda i: (0, 0)),               # wo^T
            pl.BlockSpec((bsz, S, HEAD_DIM), lambda i: (0, 0, 0)),      # cos
            pl.BlockSpec((bsz, S, HEAD_DIM), lambda i: (0, 0, 0)),      # sin
            pl.BlockSpec((None, S, S), lambda i: (i, 0, 0)),            # mask/branch
        ],
        out_specs=pl.BlockSpec((None, bsz * S, HIDDEN), lambda i: (i, 0, 0)),
        compiler_params=pltpu.CompilerParams(
            dimension_semantics=("parallel",)),          # 2 branch slabs -> 2 TCs on v7x
    )(h3, params["wqkv_t"], params["wo_t"], cos, sin, masks)

    return out.reshape(bsz2, S, HIDDEN)                  # [full..., local...]


# ----------------------- pure-JAX reference (for checking) --------------------
def _ref_linear(x, w):
    return jnp.einsum("...k,nk->...n", x, w)


def _rotate_half(x):
    d = x.shape[-1] // 2
    return jnp.concatenate([-x[..., d:], x[..., :d]], axis=-1)


def _ref_apply_rotary(q, k, cos, sin):
    cos = cos[:, :, None, :]
    sin = sin[:, :, None, :]
    return q * cos + _rotate_half(q) * sin, k * cos + _rotate_half(k) * sin


def _ref_attention(q, k, v, *, is_local, window):
    B, H, S, D = q.shape
    scores = jnp.einsum("bhqd,bhkd->bhqk", q, k) / math.sqrt(D)
    row = jnp.arange(S)[:, None]
    col = jnp.arange(S)[None, :]
    if is_local:
        w = min(window, S)
        mask = jnp.where(col >= row - (w - 1), 1.0, -jnp.inf)
        scores = scores + mask
    else:
        scores = jnp.where(col > row, -jnp.inf, scores)
    p = jax.nn.softmax(scores, axis=-1)
    return jnp.einsum("bhqk,bhkd->bhqd", p, v)


def reference_forward(raw_params, hidden_states, position_ids):
    bsz2, S, _ = hidden_states.shape
    bsz = bsz2 // 2
    full_h, local_h = hidden_states[:bsz], hidden_states[bsz:]

    def qkv(h):
        q = _ref_linear(h, raw_params["wq"]).reshape(bsz, S, NUM_HEADS, HEAD_DIM)
        k = _ref_linear(h, raw_params["wk"]).reshape(bsz, S, NUM_KV_HEADS, HEAD_DIM)
        v = _ref_linear(h, raw_params["wv"]).reshape(bsz, S, NUM_KV_HEADS, HEAD_DIM)
        return q, k, v

    fq, fk, fv = qkv(full_h)
    lq, lk, lv = qkv(local_h)
    cos, sin = rotary_cos_sin(position_ids, HEAD_DIM)
    fq, fk = _ref_apply_rotary(fq, fk, cos, sin)
    lq, lk = _ref_apply_rotary(lq, lk, cos, sin)

    def gqa(k, v):
        if GROUPS > 1:
            k = jnp.repeat(k, GROUPS, axis=2)
            v = jnp.repeat(v, GROUPS, axis=2)
        return k, v

    fk, fv = gqa(fk, fv)
    lk, lv = gqa(lk, lv)
    t = lambda x: jnp.transpose(x, (0, 2, 1, 3))
    full_out = _ref_attention(t(fq), t(fk), t(fv), is_local=False, window=WINDOW)
    local_out = _ref_attention(t(lq), t(lk), t(lv), is_local=True, window=WINDOW)
    full_out = jnp.transpose(full_out, (0, 2, 1, 3)).reshape(bsz, S, HIDDEN)
    local_out = jnp.transpose(local_out, (0, 2, 1, 3)).reshape(bsz, S, HIDDEN)
    full_out = _ref_linear(full_out, raw_params["wo"])
    local_out = _ref_linear(local_out, raw_params["wo"])
    return jnp.concatenate([full_out, local_out], axis=0)


# ----------------------------------- main --------------------------------------
if __name__ == "__main__":
    key = jax.random.PRNGKey(0)
    kq, kk, kv, ko, kx = jax.random.split(key, 5)
    w_scale = 0.05
    raw_params = {
        "wq": w_scale * jax.random.normal(kq, (QD, HIDDEN), jnp.float32),
        "wk": w_scale * jax.random.normal(kk, (KVD, HIDDEN), jnp.float32),
        "wv": w_scale * jax.random.normal(kv, (KVD, HIDDEN), jnp.float32),
        "wo": w_scale * jax.random.normal(ko, (HIDDEN, QD), jnp.float32),
    }
    params = prepare_params(raw_params)     # fuse + transpose once, outside jit

    hidden_states = jax.random.normal(kx, (2 * BSZ, Q_LEN, HIDDEN), jnp.float32)
    position_ids = jnp.broadcast_to(
        jnp.arange(Q_LEN, dtype=jnp.int32)[None, :], (BSZ, Q_LEN))

    fwd = jax.jit(duo_attention_forward)
    out = jax.block_until_ready(fwd(params, hidden_states, position_ids))

    ref = reference_forward(raw_params, hidden_states, position_ids)
    assert out.shape == (2 * BSZ, Q_LEN, HIDDEN), out.shape
    max_err = float(jnp.max(jnp.abs(out - ref)))
    assert jnp.allclose(out, ref, atol=2e-4, rtol=2e-4), max_err

    print("KERNEL_OK")
</pallas_src>

<mosaic_0001>
module attributes {stable_mosaic.version = 11 : i64} {
  func.func @_duo_attention_kernel(%arg0: i32, %arg1: memref<1x32x64xf32, #tpu.memory_space<vmem>>, %arg2: memref<64x128xf32, #tpu.memory_space<vmem>>, %arg3: memref<64x64xf32, #tpu.memory_space<vmem>>, %arg4: memref<2x16x16xf32, #tpu.memory_space<vmem>>, %arg5: memref<2x16x16xf32, #tpu.memory_space<vmem>>, %arg6: memref<1x16x16xf32, #tpu.memory_space<vmem>>, %arg7: memref<1x32x64xf32, #tpu.memory_space<vmem>>) attributes {dimension_semantics = [#tpu.dimension_semantics<parallel>], iteration_bounds = array<i64: 2>, scalar_prefetch = 0 : i64, scratch_operands = 0 : i64, tpu.core_type = #tpu.core_type<tc>, window_params = [{transform_indices = @transform_0, window_bounds = array<i64: 1, 32, 64>}, {pipeline_mode = #tpu.pipeline_mode<synchronous>, transform_indices = @transform_1, window_bounds = array<i64: 64, 128>}, {pipeline_mode = #tpu.pipeline_mode<synchronous>, transform_indices = @transform_2, window_bounds = array<i64: 64, 64>}, {pipeline_mode = #tpu.pipeline_mode<synchronous>, transform_indices = @transform_3, window_bounds = array<i64: 2, 16, 16>}, {pipeline_mode = #tpu.pipeline_mode<synchronous>, transform_indices = @transform_4, window_bounds = array<i64: 2, 16, 16>}, {transform_indices = @transform_5, window_bounds = array<i64: 1, 16, 16>}, {transform_indices = @transform_6, window_bounds = array<i64: 1, 32, 64>}]} {
    %c0 = arith.constant 0 : index
    %c0_0 = arith.constant 0 : index
    %c0_1 = arith.constant 0 : index
    %0 = vector.load %arg1[%c0, %c0_0, %c0_1] : memref<1x32x64xf32, #tpu.memory_space<vmem>>, vector<1x32x64xf32>
    %1 = vector.shape_cast %0 : vector<1x32x64xf32> to vector<32x64xf32>
    %c0_2 = arith.constant 0 : index
    %c0_3 = arith.constant 0 : index
    %2 = vector.load %arg2[%c0_2, %c0_3] : memref<64x128xf32, #tpu.memory_space<vmem>>, vector<64x128xf32>
    %cst = arith.constant dense<0.000000e+00> : vector<32x128xf32>
    %3 = tpu.matmul %1, %2, %cst {dimension_numbers = #tpu.dot_dimension_numbers<[1], [0], [0], [1], [0, 0, 1, 1], [], []>} : vector<32x64xf32>, vector<64x128xf32>, vector<32x128xf32> -> vector<32x128xf32>
    %c0_4 = arith.constant 0 : index
    %c0_5 = arith.constant 0 : index
    %c0_6 = arith.constant 0 : index
    %4 = vector.load %arg6[%c0_4, %c0_5, %c0_6] : memref<1x16x16xf32, #tpu.memory_space<vmem>>, vector<1x16x16xf32>
    %5 = vector.shape_cast %4 : vector<1x16x16xf32> to vector<16x16xf32>
    %c0_7 = arith.constant 0 : index
    %c0_8 = arith.constant 0 : index
    %c0_9 = arith.constant 0 : index
    %6 = vector.load %arg4[%c0_7, %c0_8, %c0_9] : memref<2x16x16xf32, #tpu.memory_space<vmem>>, vector<1x16x16xf32>
    %7 = vector.shape_cast %6 : vector<1x16x16xf32> to vector<16x16xf32>
    %c0_10 = arith.constant 0 : index
    %c0_11 = arith.constant 0 : index
    %c0_12 = arith.constant 0 : index
    %8 = vector.load %arg5[%c0_10, %c0_11, %c0_12] : memref<2x16x16xf32, #tpu.memory_space<vmem>>, vector<1x16x16xf32>
    %9 = vector.shape_cast %8 : vector<1x16x16xf32> to vector<16x16xf32>
    %10 = vector.extract_strided_slice %3 {offsets = [0, 64], sizes = [16, 16], strides = [1, 1]} : vector<32x128xf32> to vector<16x16xf32>
    %11 = vector.extract_strided_slice %10 {offsets = [0, 8], sizes = [16, 8], strides = [1, 1]} : vector<16x16xf32> to vector<16x8xf32>
    %cst_13 = arith.constant 0.000000e+00 : f32
    %12 = vector.broadcast %cst_13 : f32 to vector<16x8xf32>
    %13 = arith.subf %12, %11 : vector<16x8xf32>
    %14 = vector.extract_strided_slice %10 {offsets = [0, 0], sizes = [16, 8], strides = [1, 1]} : vector<16x16xf32> to vector<16x8xf32>
    %15 = tpu.concatenate %13, %14 in 1 : vector<16x8xf32>, vector<16x8xf32> -> vector<16x16xf32>
    %16 = arith.mulf %10, %7 : vector<16x16xf32>
    %17 = arith.mulf %15, %9 : vector<16x16xf32>
    %18 = arith.addf %16, %17 : vector<16x16xf32>
    %19 = vector.extract_strided_slice %3 {offsets = [0, 96], sizes = [16, 16], strides = [1, 1]} : vector<32x128xf32> to vector<16x16xf32>
    %20 = vector.extract_strided_slice %3 {offsets = [0, 80], sizes = [16, 16], strides = [1, 1]} : vector<32x128xf32> to vector<16x16xf32>
    %21 = vector.extract_strided_slice %20 {offsets = [0, 8], sizes = [16, 8], strides = [1, 1]} : vector<16x16xf32> to vector<16x8xf32>
    %cst_14 = arith.constant 0.000000e+00 : f32
    %22 = vector.broadcast %cst_14 : f32 to vector<16x8xf32>
    %23 = arith.subf %22, %21 : vector<16x8xf32>
    %24 = vector.extract_strided_slice %20 {offsets = [0, 0], sizes = [16, 8], strides = [1, 1]} : vector<16x16xf32> to vector<16x8xf32>
    %25 = tpu.concatenate %23, %24 in 1 : vector<16x8xf32>, vector<16x8xf32> -> vector<16x16xf32>
    %26 = arith.mulf %20, %7 : vector<16x16xf32>
    %27 = arith.mulf %25, %9 : vector<16x16xf32>
    %28 = arith.addf %26, %27 : vector<16x16xf32>
    %29 = vector.extract_strided_slice %3 {offsets = [0, 112], sizes = [16, 16], strides = [1, 1]} : vector<32x128xf32> to vector<16x16xf32>
    %30 = vector.extract_strided_slice %3 {offsets = [0, 0], sizes = [16, 16], strides = [1, 1]} : vector<32x128xf32> to vector<16x16xf32>
    %31 = vector.extract_strided_slice %30 {offsets = [0, 8], sizes = [16, 8], strides = [1, 1]} : vector<16x16xf32> to vector<16x8xf32>
    %cst_15 = arith.constant 0.000000e+00 : f32
    %32 = vector.broadcast %cst_15 : f32 to vector<16x8xf32>
    %33 = arith.subf %32, %31 : vector<16x8xf32>
    %34 = vector.extract_strided_slice %30 {offsets = [0, 0], sizes = [16, 8], strides = [1, 1]} : vector<16x16xf32> to vector<16x8xf32>
    %35 = tpu.concatenate %33, %34 in 1 : vector<16x8xf32>, vector<16x8xf32> -> vector<16x16xf32>
    %36 = arith.mulf %30, %7 : vector<16x16xf32>
    %37 = arith.mulf %35, %9 : vector<16x16xf32>
    %38 = arith.addf %36, %37 : vector<16x16xf32>
    %cst_16 = arith.constant dense<0.000000e+00> : vector<16x16xf32>
    %39 = tpu.matmul %38, %18, %cst_16 {dimension_numbers = #tpu.dot_dimension_numbers<[1], [1], [0], [0], [0, 0, 1, 0], [], []>} : vector<16x16xf32>, vector<16x16xf32>, vector<16x16xf32> -> vector<16x16xf32>
    %cst_17 = arith.constant 2.500000e-01 : f32
    %40 = vector.broadcast %cst_17 : f32 to vector<16x16xf32>
    %41 = arith.mulf %39, %40 : vector<16x16xf32>
    %42 = arith.addf %41, %5 : vector<16x16xf32>
    %cst_18 = arith.constant dense<0xFF800000> : vector<16xf32>
    %43 = vector.multi_reduction <maximumf>, %42, %cst_18 [1] : vector<16x16xf32> to vector<16xf32>
    %44 = vector.shape_cast %43 : vector<16xf32> to vector<16x1xf32>
    %45 = vector.broadcast %44 : vector<16x1xf32> to vector<16x16xf32>
    %46 = arith.subf %42, %45 : vector<16x16xf32>
    %47 = math.exp %46 : vector<16x16xf32>
    %cst_19 = arith.constant dense<0.000000e+00> : vector<16xf32>
    %48 = vector.multi_reduction <add>, %47, %cst_19 [1] : vector<16x16xf32> to vector<16xf32>
    %49 = vector.shape_cast %48 : vector<16xf32> to vector<16x1xf32>
    %50 = vector.broadcast %49 : vector<16x1xf32> to vector<16x16xf32>
    %51 = arith.divf %47, %50 : vector<16x16xf32>
    %cst_20 = arith.constant dense<0.000000e+00> : vector<16x16xf32>
    %52 = tpu.matmul %51, %19, %cst_20 {dimension_numbers = #tpu.dot_dimension_numbers<[1], [0], [0], [1], [0, 0, 1, 1], [], []>} : vector<16x16xf32>, vector<16x16xf32>, vector<16x16xf32> -> vector<16x16xf32>
    %53 = vector.extract_strided_slice %3 {offsets = [0, 16], sizes = [16, 16], strides = [1, 1]} : vector<32x128xf32> to vector<16x16xf32>
    %54 = vector.extract_strided_slice %53 {offsets = [0, 8], sizes = [16, 8], strides = [1, 1]} : vector<16x16xf32> to vector<16x8xf32>
    %cst_21 = arith.constant 0.000000e+00 : f32
    %55 = vector.broadcast %cst_21 : f32 to vector<16x8xf32>
    %56 = arith.subf %55, %54 : vector<16x8xf32>
    %57 = vector.extract_strided_slice %53 {offsets = [0, 0], sizes = [16, 8], strides = [1, 1]} : vector<16x16xf32> to vector<16x8xf32>
    %58 = tpu.concatenate %56, %57 in 1 : vector<16x8xf32>, vector<16x8xf32> -> vector<16x16xf32>
    %59 = arith.mulf %53, %7 : vector<16x16xf32>
    %60 = arith.mulf %58, %9 : vector<16x16xf32>
    %61 = arith.addf %59, %60 : vector<16x16xf32>
    %cst_22 = arith.constant dense<0.000000e+00> : vector<16x16xf32>
    %62 = tpu.matmul %61, %18, %cst_22 {dimension_numbers = #tpu.dot_dimension_numbers<[1], [1], [0], [0], [0, 0, 1, 0], [], []>} : vector<16x16xf32>, vector<16x16xf32>, vector<16x16xf32> -> vector<16x16xf32>
    %cst_23 = arith.constant 2.500000e-01 : f32
    %63 = vector.broadcast %cst_23 : f32 to vector<16x16xf32>
    %64 = arith.mulf %62, %63 : vector<16x16xf32>
    %65 = arith.addf %64, %5 : vector<16x16xf32>
    %cst_24 = arith.constant dense<0xFF800000> : vector<16xf32>
    %66 = vector.multi_reduction <maximumf>, %65, %cst_24 [1] : vector<16x16xf32> to vector<16xf32>
    %67 = vector.shape_cast %66 : vector<16xf32> to vector<16x1xf32>
    %68 = vector.broadcast %67 : vector<16x1xf32> to vector<16x16xf32>
    %69 = arith.subf %65, %68 : vector<16x16xf32>
    %70 = math.exp %69 : vector<16x16xf32>
    %cst_25 = arith.constant dense<0.000000e+00> : vector<16xf32>
    %71 = vector.multi_reduction <add>, %70, %cst_25 [1] : vector<16x16xf32> to vector<16xf32>
    %72 = vector.shape_cast %71 : vector<16xf32> to vector<16x1xf32>
    %73 = vector.broadcast %72 : vector<16x1xf32> to vector<16x16xf32>
    %74 = arith.divf %70, %73 : vector<16x16xf32>
    %cst_26 = arith.constant dense<0.000000e+00> : vector<16x16xf32>
    %75 = tpu.matmul %74, %19, %cst_26 {dimension_numbers = #tpu.dot_dimension_numbers<[1], [0], [0], [1], [0, 0, 1, 1], [], []>} : vector<16x16xf32>, vector<16x16xf32>, vector<16x16xf32> -> vector<16x16xf32>
    %76 = vector.extract_strided_slice %3 {offsets = [0, 32], sizes = [16, 16], strides = [1, 1]} : vector<32x128xf32> to vector<16x16xf32>
    %77 = vector.extract_strided_slice %76 {offsets = [0, 8], sizes = [16, 8], strides = [1, 1]} : vector<16x16xf32> to vector<16x8xf32>
    %cst_27 = arith.constant 0.000000e+00 : f32
    %78 = vector.broadcast %cst_27 : f32 to vector<16x8xf32>
    %79 = arith.subf %78, %77 : vector<16x8xf32>
    %80 = vector.extract_strided_slice %76 {offsets = [0, 0], sizes = [16, 8], strides = [1, 1]} : vector<16x16xf32> to vector<16x8xf32>
    %81 = tpu.concatenate %79, %80 in 1 : vector<16x8xf32>, vector<16x8xf32> -> vector<16x16xf32>
    %82 = arith.mulf %76, %7 : vector<16x16xf32>
    %83 = arith.mulf %81, %9 : vector<16x16xf32>
    %84 = arith.addf %82, %83 : vector<16x16xf32>
    %cst_28 = arith.constant dense<0.000000e+00> : vector<16x16xf32>
    %85 = tpu.matmul %84, %28, %cst_28 {dimension_numbers = #tpu.dot_dimension_numbers<[1], [1], [0], [0], [0, 0, 1, 0], [], []>} : vector<16x16xf32>, vector<16x16xf32>, vector<16x16xf32> -> vector<16x16xf32>
    %cst_29 = arith.constant 2.500000e-01 : f32
    %86 = vector.broadcast %cst_29 : f32 to vector<16x16xf32>
    %87 = arith.mulf %85, %86 : vector<16x16xf32>
    %88 = arith.addf %87, %5 : vector<16x16xf32>
    %cst_30 = arith.constant dense<0xFF800000> : vector<16xf32>
    %89 = vector.multi_reduction <maximumf>, %88, %cst_30 [1] : vector<16x16xf32> to vector<16xf32>
    %90 = vector.shape_cast %89 : vector<16xf32> to vector<16x1xf32>
    %91 = vector.broadcast %90 : vector<16x1xf32> to vector<16x16xf32>
    %92 = arith.subf %88, %91 : vector<16x16xf32>
    %93 = math.exp %92 : vector<16x16xf32>
    %cst_31 = arith.constant dense<0.000000e+00> : vector<16xf32>
    %94 = vector.multi_reduction <add>, %93, %cst_31 [1] : vector<16x16xf32> to vector<16xf32>
    %95 = vector.shape_cast %94 : vector<16xf32> to vector<16x1xf32>
    %96 = vector.broadcast %95 : vector<16x1xf32> to vector<16x16xf32>
    %97 = arith.divf %93, %96 : vector<16x16xf32>
    %cst_32 = arith.constant dense<0.000000e+00> : vector<16x16xf32>
    %98 = tpu.matmul %97, %29, %cst_32 {dimension_numbers = #tpu.dot_dimension_numbers<[1], [0], [0], [1], [0, 0, 1, 1], [], []>} : vector<16x16xf32>, vector<16x16xf32>, vector<16x16xf32> -> vector<16x16xf32>
    %99 = vector.extract_strided_slice %3 {offsets = [0, 48], sizes = [16, 16], strides = [1, 1]} : vector<32x128xf32> to vector<16x16xf32>
    %100 = vector.extract_strided_slice %99 {offsets = [0, 8], sizes = [16, 8], strides = [1, 1]} : vector<16x16xf32> to vector<16x8xf32>
    %cst_33 = arith.constant 0.000000e+00 : f32
    %101 = vector.broadcast %cst_33 : f32 to vector<16x8xf32>
    %102 = arith.subf %101, %100 : vector<16x8xf32>
    %103 = vector.extract_strided_slice %99 {offsets = [0, 0], sizes = [16, 8], strides = [1, 1]} : vector<16x16xf32> to vector<16x8xf32>
    %104 = tpu.concatenate %102, %103 in 1 : vector<16x8xf32>, vector<16x8xf32> -> vector<16x16xf32>
    %105 = arith.mulf %99, %7 : vector<16x16xf32>
    %106 = arith.mulf %104, %9 : vector<16x16xf32>
    %107 = arith.addf %105, %106 : vector<16x16xf32>
    %cst_34 = arith.constant dense<0.000000e+00> : vector<16x16xf32>
    %108 = tpu.matmul %107, %28, %cst_34 {dimension_numbers = #tpu.dot_dimension_numbers<[1], [1], [0], [0], [0, 0, 1, 0], [], []>} : vector<16x16xf32>, vector<16x16xf32>, vector<16x16xf32> -> vector<16x16xf32>
    %cst_35 = arith.constant 2.500000e-01 : f32
    %109 = vector.broadcast %cst_35 : f32 to vector<16x16xf32>
    %110 = arith.mulf %108, %109 : vector<16x16xf32>
    %111 = arith.addf %110, %5 : vector<16x16xf32>
    %cst_36 = arith.constant dense<0xFF800000> : vector<16xf32>
    %112 = vector.multi_reduction <maximumf>, %111, %cst_36 [1] : vector<16x16xf32> to vector<16xf32>
    %113 = vector.shape_cast %112 : vector<16xf32> to vector<16x1xf32>
    %114 = vector.broadcast %113 : vector<16x1xf32> to vector<16x16xf32>
    %115 = arith.subf %111, %114 : vector<16x16xf32>
    %116 = math.exp %115 : vector<16x16xf32>
    %cst_37 = arith.constant dense<0.000000e+00> : vector<16xf32>
    %117 = vector.multi_reduction <add>, %116, %cst_37 [1] : vector<16x16xf32> to vector<16xf32>
    %118 = vector.shape_cast %117 : vector<16xf32> to vector<16x1xf32>
    %119 = vector.broadcast %118 : vector<16x1xf32> to vector<16x16xf32>
    %120 = arith.divf %116, %119 : vector<16x16xf32>
    %cst_38 = arith.constant dense<0.000000e+00> : vector<16x16xf32>
    %121 = tpu.matmul %120, %29, %cst_38 {dimension_numbers = #tpu.dot_dimension_numbers<[1], [0], [0], [1], [0, 0, 1, 1], [], []>} : vector<16x16xf32>, vector<16x16xf32>, vector<16x16xf32> -> vector<16x16xf32>
    %122 = tpu.concatenate %52, %75, %98, %121 in 1 : vector<16x16xf32>, vector<16x16xf32>, vector<16x16xf32>, vector<16x16xf32> -> vector<16x64xf32>
    %c1 = arith.constant 1 : index
    %c0_39 = arith.constant 0 : index
    %c0_40 = arith.constant 0 : index
    %123 = vector.load %arg4[%c1, %c0_39, %c0_40] : memref<2x16x16xf32, #tpu.memory_space<vmem>>, vector<1x16x16xf32>
    %124 = vector.shape_cast %123 : vector<1x16x16xf32> to vector<16x16xf32>
    %c1_41 = arith.constant 1 : index
    %c0_42 = arith.constant 0 : index
    %c0_43 = arith.constant 0 : index
    %125 = vector.load %arg5[%c1_41, %c0_42, %c0_43] : memref<2x16x16xf32, #tpu.memory_space<vmem>>, vector<1x16x16xf32>
    %126 = vector.shape_cast %125 : vector<1x16x16xf32> to vector<16x16xf32>
    %127 = vector.extract_strided_slice %3 {offsets = [16, 64], sizes = [16, 16], strides = [1, 1]} : vector<32x128xf32> to vector<16x16xf32>
    %128 = vector.extract_strided_slice %127 {offsets = [0, 8], sizes = [16, 8], strides = [1, 1]} : vector<16x16xf32> to vector<16x8xf32>
    %cst_44 = arith.constant 0.000000e+00 : f32
    %129 = vector.broadcast %cst_44 : f32 to vector<16x8xf32>
    %130 = arith.subf %129, %128 : vector<16x8xf32>
    %131 = vector.extract_strided_slice %127 {offsets = [0, 0], sizes = [16, 8], strides = [1, 1]} : vector<16x16xf32> to vector<16x8xf32>
    %132 = tpu.concatenate %130, %131 in 1 : vector<16x8xf32>, vector<16x8xf32> -> vector<16x16xf32>
    %133 = arith.mulf %127, %124 : vector<16x16xf32>
    %134 = arith.mulf %132, %126 : vector<16x16xf32>
    %135 = arith.addf %133, %134 : vector<16x16xf32>
    %136 = vector.extract_strided_slice %3 {offsets = [16, 96], sizes = [16, 16], strides = [1, 1]} : vector<32x128xf32> to vector<16x16xf32>
    %137 = vector.extract_strided_slice %3 {offsets = [16, 80], sizes = [16, 16], strides = [1, 1]} : vector<32x128xf32> to vector<16x16xf32>
    %138 = vector.extract_strided_slice %137 {offsets = [0, 8], sizes = [16, 8], strides = [1, 1]} : vector<16x16xf32> to vector<16x8xf32>
    %cst_45 = arith.constant 0.000000e+00 : f32
    %139 = vector.broadcast %cst_45 : f32 to vector<16x8xf32>
    %140 = arith.subf %139, %138 : vector<16x8xf32>
    %141 = vector.extract_strided_slice %137 {offsets = [0, 0], sizes = [16, 8], strides = [1, 1]} : vector<16x16xf32> to vector<16x8xf32>
    %142 = tpu.concatenate %140, %141 in 1 : vector<16x8xf32>, vector<16x8xf32> -> vector<16x16xf32>
    %143 = arith.mulf %137, %124 : vector<16x16xf32>
    %144 = arith.mulf %142, %126 : vector<16x16xf32>
    %145 = arith.addf %143, %144 : vector<16x16xf32>
    %146 = vector.extract_strided_slice %3 {offsets = [16, 112], sizes = [16, 16], strides = [1, 1]} : vector<32x128xf32> to vector<16x16xf32>
    %147 = vector.extract_strided_slice %3 {offsets = [16, 0], sizes = [16, 16], strides = [1, 1]} : vector<32x128xf32> to vector<16x16xf32>
    %148 = vector.extract_strided_slice %147 {offsets = [0, 8], sizes = [16, 8], strides = [1, 1]} : vector<16x16xf32> to vector<16x8xf32>
    %cst_46 = arith.constant 0.000000e+00 : f32
    %149 = vector.broadcast %cst_46 : f32 to vector<16x8xf32>
    %150 = arith.subf %149, %148 : vector<16x8xf32>
    %151 = vector.extract_strided_slice %147 {offsets = [0, 0], sizes = [16, 8], strides = [1, 1]} : vector<16x16xf32> to vector<16x8xf32>
    %152 = tpu.concatenate %150, %151 in 1 : vector<16x8xf32>, vector<16x8xf32> -> vector<16x16xf32>
    %153 = arith.mulf %147, %124 : vector<16x16xf32>
    %154 = arith.mulf %152, %126 : vector<16x16xf32>
    %155 = arith.addf %153, %154 : vector<16x16xf32>
    %cst_47 = arith.constant dense<0.000000e+00> : vector<16x16xf32>
    %156 = tpu.matmul %155, %135, %cst_47 {dimension_numbers = #tpu.dot_dimension_numbers<[1], [1], [0], [0], [0, 0, 1, 0], [], []>} : vector<16x16xf32>, vector<16x16xf32>, vector<16x16xf32> -> vector<16x16xf32>
    %cst_48 = arith.constant 2.500000e-01 : f32
    %157 = vector.broadcast %cst_48 : f32 to vector<16x16xf32>
    %158 = arith.mulf %156, %157 : vector<16x16xf32>
    %159 = arith.addf %158, %5 : vector<16x16xf32>
    %cst_49 = arith.constant dense<0xFF800000> : vector<16xf32>
    %160 = vector.multi_reduction <maximumf>, %159, %cst_49 [1] : vector<16x16xf32> to vector<16xf32>
    %161 = vector.shape_cast %160 : vector<16xf32> to vector<16x1xf32>
    %162 = vector.broadcast %161 : vector<16x1xf32> to vector<16x16xf32>
    %163 = arith.subf %159, %162 : vector<16x16xf32>
    %164 = math.exp %163 : vector<16x16xf32>
    %cst_50 = arith.constant dense<0.000000e+00> : vector<16xf32>
    %165 = vector.multi_reduction <add>, %164, %cst_50 [1] : vector<16x16xf32> to vector<16xf32>
    %166 = vector.shape_cast %165 : vector<16xf32> to vector<16x1xf32>
    %167 = vector.broadcast %166 : vector<16x1xf32> to vector<16x16xf32>
    %168 = arith.divf %164, %167 : vector<16x16xf32>
    %cst_51 = arith.constant dense<0.000000e+00> : vector<16x16xf32>
    %169 = tpu.matmul %168, %136, %cst_51 {dimension_numbers = #tpu.dot_dimension_numbers<[1], [0], [0], [1], [0, 0, 1, 1], [], []>} : vector<16x16xf32>, vector<16x16xf32>, vector<16x16xf32> -> vector<16x16xf32>
    %170 = vector.extract_strided_slice %3 {offsets = [16, 16], sizes = [16, 16], strides = [1, 1]} : vector<32x128xf32> to vector<16x16xf32>
    %171 = vector.extract_strided_slice %170 {offsets = [0, 8], sizes = [16, 8], strides = [1, 1]} : vector<16x16xf32> to vector<16x8xf32>
    %cst_52 = arith.constant 0.000000e+00 : f32
    %172 = vector.broadcast %cst_52 : f32 to vector<16x8xf32>
    %173 = arith.subf %172, %171 : vector<16x8xf32>
    %174 = vector.extract_strided_slice %170 {offsets = [0, 0], sizes = [16, 8], strides = [1, 1]} : vector<16x16xf32> to vector<16x8xf32>
    %175 = tpu.concatenate %173, %174 in 1 : vector<16x8xf32>, vector<16x8xf32> -> vector<16x16xf32>
    %176 = arith.mulf %170, %124 : vector<16x16xf32>
    %177 = arith.mulf %175, %126 : vector<16x16xf32>
    %178 = arith.addf %176, %177 : vector<16x16xf32>
    %cst_53 = arith.constant dense<0.000000e+00> : vector<16x16xf32>
    %179 = tpu.matmul %178, %135, %cst_53 {dimension_numbers = #tpu.dot_dimension_numbers<[1], [1], [0], [0], [0, 0, 1, 0], [], []>} : vector<16x16xf32>, vector<16x16xf32>, vector<16x16xf32> -> vector<16x16xf32>
    %cst_54 = arith.constant 2.500000e-01 : f32
    %180 = vector.broadcast %cst_54 : f32 to vector<16x16xf32>
    %181 = arith.mulf %179, %180 : vector<16x16xf32>
    %182 = arith.addf %181, %5 : vector<16x16xf32>
    %cst_55 = arith.constant dense<0xFF800000> : vector<16xf32>
    %183 = vector.multi_reduction <maximumf>, %182, %cst_55 [1] : vector<16x16xf32> to vector<16xf32>
    %184 = vector.shape_cast %183 : vector<16xf32> to vector<16x1xf32>
    %185 = vector.broadcast %184 : vector<16x1xf32> to vector<16x16xf32>
    %186 = arith.subf %182, %185 : vector<16x16xf32>
    %187 = math.exp %186 : vector<16x16xf32>
    %cst_56 = arith.constant dense<0.000000e+00> : vector<16xf32>
    %188 = vector.multi_reduction <add>, %187, %cst_56 [1] : vector<16x16xf32> to vector<16xf32>
    %189 = vector.shape_cast %188 : vector<16xf32> to vector<16x1xf32>
    %190 = vector.broadcast %189 : vector<16x1xf32> to vector<16x16xf32>
    %191 = arith.divf %187, %190 : vector<16x16xf32>
    %cst_57 = arith.constant dense<0.000000e+00> : vector<16x16xf32>
    %192 = tpu.matmul %191, %136, %cst_57 {dimension_numbers = #tpu.dot_dimension_numbers<[1], [0], [0], [1], [0, 0, 1, 1], [], []>} : vector<16x16xf32>, vector<16x16xf32>, vector<16x16xf32> -> vector<16x16xf32>
    %193 = vector.extract_strided_slice %3 {offsets = [16, 32], sizes = [16, 16], strides = [1, 1]} : vector<32x128xf32> to vector<16x16xf32>
    %194 = vector.extract_strided_slice %193 {offsets = [0, 8], sizes = [16, 8], strides = [1, 1]} : vector<16x16xf32> to vector<16x8xf32>
    %cst_58 = arith.constant 0.000000e+00 : f32
    %195 = vector.broadcast %cst_58 : f32 to vector<16x8xf32>
    %196 = arith.subf %195, %194 : vector<16x8xf32>
    %197 = vector.extract_strided_slice %193 {offsets = [0, 0], sizes = [16, 8], strides = [1, 1]} : vector<16x16xf32> to vector<16x8xf32>
    %198 = tpu.concatenate %196, %197 in 1 : vector<16x8xf32>, vector<16x8xf32> -> vector<16x16xf32>
    %199 = arith.mulf %193, %124 : vector<16x16xf32>
    %200 = arith.mulf %198, %126 : vector<16x16xf32>
    %201 = arith.addf %199, %200 : vector<16x16xf32>
    %cst_59 = arith.constant dense<0.000000e+00> : vector<16x16xf32>
    %202 = tpu.matmul %201, %145, %cst_59 {dimension_numbers = #tpu.dot_dimension_numbers<[1], [1], [0], [0], [0, 0, 1, 0], [], []>} : vector<16x16xf32>, vector<16x16xf32>, vector<16x16xf32> -> vector<16x16xf32>
    %cst_60 = arith.constant 2.500000e-01 : f32
    %203 = vector.broadcast %cst_60 : f32 to vector<16x16xf32>
    %204 = arith.mulf %202, %203 : vector<16x16xf32>
    %205 = arith.addf %204, %5 : vector<16x16xf32>
    %cst_61 = arith.constant dense<0xFF800000> : vector<16xf32>
    %206 = vector.multi_reduction <maximumf>, %205, %cst_61 [1] : vector<16x16xf32> to vector<16xf32>
    %207 = vector.shape_cast %206 : vector<16xf32> to vector<16x1xf32>
    %208 = vector.broadcast %207 : vector<16x1xf32> to vector<16x16xf32>
    %209 = arith.subf %205, %208 : vector<16x16xf32>
    %210 = math.exp %209 : vector<16x16xf32>
    %cst_62 = arith.constant dense<0.000000e+00> : vector<16xf32>
    %211 = vector.multi_reduction <add>, %210, %cst_62 [1] : vector<16x16xf32> to vector<16xf32>
    %212 = vector.shape_cast %211 : vector<16xf32> to vector<16x1xf32>
    %213 = vector.broadcast %212 : vector<16x1xf32> to vector<16x16xf32>
    %214 = arith.divf %210, %213 : vector<16x16xf32>
    %cst_63 = arith.constant dense<0.000000e+00> : vector<16x16xf32>
    %215 = tpu.matmul %214, %146, %cst_63 {dimension_numbers = #tpu.dot_dimension_numbers<[1], [0], [0], [1], [0, 0, 1, 1], [], []>} : vector<16x16xf32>, vector<16x16xf32>, vector<16x16xf32> -> vector<16x16xf32>
    %216 = vector.extract_strided_slice %3 {offsets = [16, 48], sizes = [16, 16], strides = [1, 1]} : vector<32x128xf32> to vector<16x16xf32>
    %217 = vector.extract_strided_slice %216 {offsets = [0, 8], sizes = [16, 8], strides = [1, 1]} : vector<16x16xf32> to vector<16x8xf32>
    %cst_64 = arith.constant 0.000000e+00 : f32
    %218 = vector.broadcast %cst_64 : f32 to vector<16x8xf32>
    %219 = arith.subf %218, %217 : vector<16x8xf32>
    %220 = vector.extract_strided_slice %216 {offsets = [0, 0], sizes = [16, 8], strides = [1, 1]} : vector<16x16xf32> to vector<16x8xf32>
    %221 = tpu.concatenate %219, %220 in 1 : vector<16x8xf32>, vector<16x8xf32> -> vector<16x16xf32>
    %222 = arith.mulf %216, %124 : vector<16x16xf32>
    %223 = arith.mulf %221, %126 : vector<16x16xf32>
    %224 = arith.addf %222, %223 : vector<16x16xf32>
    %cst_65 = arith.constant dense<0.000000e+00> : vector<16x16xf32>
    %225 = tpu.matmul %224, %145, %cst_65 {dimension_numbers = #tpu.dot_dimension_numbers<[1], [1], [0], [0], [0, 0, 1, 0], [], []>} : vector<16x16xf32>, vector<16x16xf32>, vector<16x16xf32> -> vector<16x16xf32>
    %cst_66 = arith.constant 2.500000e-01 : f32
    %226 = vector.broadcast %cst_66 : f32 to vector<16x16xf32>
    %227 = arith.mulf %225, %226 : vector<16x16xf32>
    %228 = arith.addf %227, %5 : vector<16x16xf32>
    %cst_67 = arith.constant dense<0xFF800000> : vector<16xf32>
    %229 = vector.multi_reduction <maximumf>, %228, %cst_67 [1] : vector<16x16xf32> to vector<16xf32>
    %230 = vector.shape_cast %229 : vector<16xf32> to vector<16x1xf32>
    %231 = vector.broadcast %230 : vector<16x1xf32> to vector<16x16xf32>
    %232 = arith.subf %228, %231 : vector<16x16xf32>
    %233 = math.exp %232 : vector<16x16xf32>
    %cst_68 = arith.constant dense<0.000000e+00> : vector<16xf32>
    %234 = vector.multi_reduction <add>, %233, %cst_68 [1] : vector<16x16xf32> to vector<16xf32>
    %235 = vector.shape_cast %234 : vector<16xf32> to vector<16x1xf32>
    %236 = vector.broadcast %235 : vector<16x1xf32> to vector<16x16xf32>
    %237 = arith.divf %233, %236 : vector<16x16xf32>
    %cst_69 = arith.constant dense<0.000000e+00> : vector<16x16xf32>
    %238 = tpu.matmul %237, %146, %cst_69 {dimension_numbers = #tpu.dot_dimension_numbers<[1], [0], [0], [1], [0, 0, 1, 1], [], []>} : vector<16x16xf32>, vector<16x16xf32>, vector<16x16xf32> -> vector<16x16xf32>
    %239 = tpu.concatenate %169, %192, %215, %238 in 1 : vector<16x16xf32>, vector<16x16xf32>, vector<16x16xf32>, vector<16x16xf32> -> vector<16x64xf32>
    %240 = tpu.concatenate %122, %239 in 0 : vector<16x64xf32>, vector<16x64xf32> -> vector<32x64xf32>
    %c0_70 = arith.constant 0 : index
    %c0_71 = arith.constant 0 : index
    %241 = vector.load %arg3[%c0_70, %c0_71] : memref<64x64xf32, #tpu.memory_space<vmem>>, vector<64x64xf32>
    %cst_72 = arith.constant dense<0.000000e+00> : vector<32x64xf32>
    %242 = tpu.matmul %240, %241, %cst_72 {dimension_numbers = #tpu.dot_dimension_numbers<[1], [0], [0], [1], [0, 0, 1, 1], [], []>} : vector<32x64xf32>, vector<64x64xf32>, vector<32x64xf32> -> vector<32x64xf32>
    %c0_73 = arith.constant 0 : index
    %c0_74 = arith.constant 0 : index
    %c0_75 = arith.constant 0 : index
    %243 = vector.load %arg7[%c0_73, %c0_74, %c0_75] : memref<1x32x64xf32, #tpu.memory_space<vmem>>, vector<1x32x64xf32>
    %244 = vector.shape_cast %243 : vector<1x32x64xf32> to vector<32x64xf32>
    %245 = vector.shape_cast %242 : vector<32x64xf32> to vector<1x32x64xf32>
    tpu.vector_store %arg7[%c0_73, %c0_74, %c0_75], %245 {strides = array<i32>} : memref<1x32x64xf32, #tpu.memory_space<vmem>>, vector<1x32x64xf32>,
    return
  }
  func.func @transform_0(%arg0: i32) -> (i32, i32, i32) {
    %c0_i32 = arith.constant 0 : i32
    %c0_i32_0 = arith.constant 0 : i32
    %c0_i32_1 = arith.constant 0 : i32
    return %arg0, %c0_i32, %c0_i32_0 : i32, i32, i32
  }
  func.func @transform_1(%arg0: i32) -> (i32, i32) {
    %c0_i32 = arith.constant 0 : i32
    %c0_i32_0 = arith.constant 0 : i32
    %c0_i32_1 = arith.constant 0 : i32
    return %c0_i32, %c0_i32_0 : i32, i32
  }
  func.func @transform_2(%arg0: i32) -> (i32, i32) {
    %c0_i32 = arith.constant 0 : i32
    %c0_i32_0 = arith.constant 0 : i32
    %c0_i32_1 = arith.constant 0 : i32
    return %c0_i32, %c0_i32_0 : i32, i32
  }
  func.func @transform_3(%arg0: i32) -> (i32, i32, i32) {
    %c0_i32 = arith.constant 0 : i32
    %c0_i32_0 = arith.constant 0 : i32
    %c0_i32_1 = arith.constant 0 : i32
    %c0_i32_2 = arith.constant 0 : i32
    return %c0_i32, %c0_i32_0, %c0_i32_1 : i32, i32, i32
  }
  func.func @transform_4(%arg0: i32) -> (i32, i32, i32) {
    %c0_i32 = arith.constant 0 : i32
    %c0_i32_0 = arith.constant 0 : i32
    %c0_i32_1 = arith.constant 0 : i32
    %c0_i32_2 = arith.constant 0 : i32
    return %c0_i32, %c0_i32_0, %c0_i32_1 : i32, i32, i32
  }
  func.func @transform_5(%arg0: i32) -> (i32, i32, i32) {
    %c0_i32 = arith.constant 0 : i32
    %c0_i32_0 = arith.constant 0 : i32
    %c0_i32_1 = arith.constant 0 : i32
    return %arg0, %c0_i32, %c0_i32_0 : i32, i32, i32
  }
  func.func @transform_6(%arg0: i32) -> (i32, i32, i32) {
    %c0_i32 = arith.constant 0 : i32
    %c0_i32_0 = arith.constant 0 : i32
    %c0_i32_1 = arith.constant 0 : i32
    return %arg0, %c0_i32, %c0_i32_0 : i32, i32, i32
  }
}

</mosaic_0001>

<bundles_post_ra>
// kernel: duo_attention_forward.1
= control target key start
LH: loop header
LB: loop body
LE: loop exit
PB: predicated region body
PF: predicated region fallthrough
CT: control target
= control target key end

     0   :  { %11 = vsyncpa [#allocation3], 0  ;;  %s4074_s0 = inlined_call_operand.vmem [shape: f32[2,32,64], index: 0, kind: input, shape index: {}]   ;;  %s4075_s1 = inlined_call_operand.vmem [shape: f32[64,128], index: 1, kind: input, shape index: {}]   ;;  %s4076_s2 = inlined_call_operand.vmem [shape: f32[64,64], index: 2, kind: input, shape index: {}]   ;;  %s4077_s3 = inlined_call_operand.vmem [shape: f32[2,16,16], index: 3, kind: input, shape index: {}]   ;;  %s4078_s4 = inlined_call_operand.vmem [shape: f32[2,16,16], index: 4, kind: input, shape index: {}]   ;;  %s4079_s5 = inlined_call_operand.vmem [shape: f32[2,16,16], index: 5, kind: input, shape index: {}]   ;;  %s4080_s6 = inlined_call_operand.hbm [shape: f32[2,32,64], index: 6, kind: output, shape index: {}]  }
   0x1   :  { %13 = vsyncpa [#allocation3 + $0x1], 0  ;;  %s3349_s21 = smov 0   ;;  %s3351_s22 = smov 0  }
   0x2   :  { %s3353_s23 = smov 0   ;;  %s3355_s24 = smov 0  }
   0x3 LB: > { %s3370_s25 = sadd.s32 4294967295, %s3296_s24   ;;  %s2641_s26 = sadd.s32 4294967294, %s3296_s24   ;;  %s3296_s24 = sphi %s3355_s24, %s4106_s24   ;;  %s3292_s23 = sphi %s3353_s23, %s4105_s23   ;;  %s3288_s22 = sphi %s3351_s22, %s4104_s22   ;;  %s3284_s21 = sphi %s3349_s21, %s4103_s21  }
   0x4   : > { %s3374_s27 = sadd.s32 1, %s3296_s24   ;;  %s162_s28 = sadd.s32 1, %s3292_s23 }
   0x5   : > { %s159_s29 = ssub.s32 %s3296_s24, %s3374_s27  ;;  %p172_p0 = scmp.ne.s32.totalorder %s3292_s23, %s3288_s22 }
   0x6   : > { %p160_p1 = scmp.eq.s32.totalorder %s159_s29, 0  ;;  %p173_p2 = scmp.eq.s32.totalorder %s3370_s25, 1 }
   0x7   : > { %p178_p3 = scmp.ne.s32.totalorder %s3288_s22, %s3284_s21  ;;  %p179_p4 = scmp.eq.s32.totalorder %s2641_s26, 1 }
   0x8   : > { %s3385_s30 = scalar_select %p160_p1, %s3292_s23, %s162_s28  }
   0x9   : > { %p3387_p5 = por %p173_p2, %p172_p0  ;;  %p3391_p6 = por %p179_p4, %p178_p3 }
   0xa   : > { %p2644_p7 = scmp.ge.s32.totalorder %s3296_s24, 1  ;;  %p225_p8 = scmp.lt.s32.totalorder %s3296_s24, 3 }
   0xc   : > { %p226_p9 = pnand %p2644_p7, %p225_p8 }
   0xd   : > { %v274_v0 = vld [vmem:[%s4075_s1] sm:$0xff] (!%p226_p9)  ;;  %v275_v1 = vld [vmem:[%s4075_s1 + $0x8] sm:$0xff] (!%p226_p9)  ;;  %v276_v2 = vld [vmem:[%s4075_s1 + $0x10] sm:$0xff] (!%p226_p9)  ;;  %p260_p10 = scmp.lt.s32.totalorder (!%p226_p9), %s3370_s25, 1  ;;  %vm282_vm0 = vcmask (!%p226_p9), 523264   ;;  %s4081_s15 = smov (!%p226_p9), 72  }
   0xe   : > { %229 = sbr.rel (%p226_p9) target bundleno = 5275 (0x149b), region = 44  ;;  %v2962_v3 = vpack.c.bf16 (!%p226_p9), %v275_v1, %v274_v0  ;;  %v277_v4 = vld [vmem:[%s4075_s1 + $0x18] sm:$0xff] (!%p226_p9)  ;;  %v278_v6 = vld [vmem:[%s4075_s1 + $0x20] sm:$0xff] (!%p226_p9)  ;;  %v279_v7 = vld [vmem:[%s4075_s1 + $0x28] sm:$0xff] (!%p226_p9)  ;;  %s4091_s16 = smov (!%p226_p9), 56   ;;  %vm404_vm1 = vcmask (!%p226_p9), 64512  }
   0xf   : > { %v2966_v5 = vpack.c.bf16 (!%p226_p9), %v277_v4, %v276_v2  ;;  %v2970_v8 = vpack.c.bf16 (!%p226_p9), %v279_v7, %v278_v6  ;;  %v280_v9 = vld [vmem:[%s4075_s1 + $0x30] sm:$0xff] (!%p226_p9)  ;;  %v281_v10 = vld [vmem:[%s4075_s1 + $0x38] sm:$0xff] (!%p226_p9)  ;;  %v3460_v19 = vld [vmem:[%s4077_s3 + $0x8] sm:$0xff] (!%p226_p9)  ;;  %s3300_s19 = smov (!%p226_p9), 64   ;;  %s3301_s13 = smov (!%p226_p9), 120   ;;  %vm489_vm2 = vcmask (!%p226_p9), 130048  }
  0x10   : > { %2963 = vmatprep.subr.bf16.mxu0 (!%p226_p9), %v2962_v3  ;;  %v2974_v12 = vpack.c.bf16 (!%p226_p9), %v281_v10, %v280_v9  ;;  %v3467_v20 = vld [vmem:[%s4077_s3] sm:$0xff] (!%p226_p9)  ;;  %v3481_v26 = vld [vmem:[%s4078_s4 + $0x8] sm:$0xff] (!%p226_p9)  ;;  %s3302_s14 = smov (!%p226_p9), 104   ;;  %s4089_s17 = smov (!%p226_p9), 88   ;;  %vm3524_vm3 = vmpackc.low (!%p226_p9), %vm489_vm2, %vm489_vm2  ;;  %vm1408_vm4 = vcmask (!%p226_p9), 261120   ;;  %vm1411_vm5 = vcmask (!%p226_p9), 392192  }
  0x11   : > { %2965 = vmatpush3.bf16.msra.mxu0 (!%p226_p9), %v2962_v3  ;;  %v3474_v22 = vld [vmem:[%s4078_s4] sm:$0xff] (!%p226_p9)  ;;  %s3304_s18 = smov (!%p226_p9), 8   ;;  %s3305_s20 = smov (!%p226_p9), 40  }
  0x12   : > { %2967 = vmatprep.subr.bf16.mxu0 (!%p226_p9), %v2966_v5  ;;  %s3307_s11 = smov (!%p226_p9), 16   ;;  %s3308_s12 = smov (!%p226_p9), 32  }
  0x13   : > { %s4083_s29 = smov (!%p226_p9), 96  }
  0x15   : > { %s3417_s26 = scalar_select %p260_p10, %s3370_s25, 1  ;;  %2969 = vmatpush3.bf16.msra.mxu0 %v2966_v5 }
  0x16   : > { %2971 = vmatprep.subr.bf16.mxu0 %v2970_v8 }
  0x17   : > { %s2715_s28 = sshll.u32 %s3417_s26, 5 }
  0x18   : > { %s3423_s10 = scalar_lea.vmem %s4074_s0, %s2715_s28  ;;  %s4085_s28 = smov 48  }
  0x19   : > { %v270_v11 = vld [vmem:[%s3423_s10] sm:$0xff]  ;;  %2973 = vmatpush3.bf16.msra.mxu0 %v2970_v8  ;;  %v271_v13 = vld [vmem:[%s3423_s10 + $0x8] sm:$0xff]  ;;  %v272_v34 = vld [vmem:[%s3423_s10 + $0x10] sm:$0xff] }
  0x1a   : > { %2822 = vmatprep.mubr.msk.f32.mxu0 %vm282_vm0, %v270_v11  ;;  %2975 = vmatprep.subr.bf16.mxu0 %v2974_v12  ;;  %v273_v37 = vld [vmem:[%s3423_s10 + $0x18] sm:$0xff]  ;;  %s2716_s10 = sshll.u32 %s3417_s26, 4  ;;  %s4087_s26 = smov 80  }
  0x1b   : > { %s3558_s9 = scalar_lea.vmem %s4079_s5, %s2716_s10  ;;  %s3309_s10 = smov 112  }
  0x1c   : > { %v3561_v62 = vld [vmem:[%s3558_s9 + $0x8] sm:$0xff]  ;;  %v3564_v0 = vld [vmem:[%s3558_s9] sm:$0xff] }
  0x1d   : > { %2977 = vmatpush3.bf16.msra.mxu0 %v2974_v12 }
  0x20   : > { %2823 = vmatmul.mubr.msk.f32.vlgmr.msra.gmra.mrb[0].mxu0 %vm282_vm0, %v271_v13 }
  0x21   : > { %2825 = vmatprep.mubr.msk.f32.mxu0 %vm282_vm0, %v272_v34 }
  0x24   : > { %2826 = vmatmul.mubr.msk.f32.gmra.mrb[2].mxu0 %vm282_vm0, %v273_v37 }
  0xf3   : > { %v3435_v14 = vpop.f32.mrb[0].mxu0 }
  0xf4   : > { %v3437_v15 = vpop.f32.mrb[1].mxu0  ;;  %v3453_v18 = vsub.f32 0.0, %v3435_v14  ;;  %v478_v56 = vmul.f32 %v3435_v14, %v3460_v19 }
  0xf5   : > { %398 = vrot.lane.b32.xlu1 %v3437_v15, %s4081_s15  ;;  %v3442_v16 = vsub.f32 0.0, %v3437_v15  ;;  %v3446_v17 = vpack.i.bf16 %v3435_v14, %v3437_v15  ;;  %v477_v50 = vmul.f32 %v3467_v20, %v3437_v15 }
  0xf7   : > { %390 = vrot.lane.b32.xlu0 %v3442_v16, %s4091_s16  ;;  %v3546_v59 = vpop.f32.mrb[2].mxu0 }
  0xf8   : > { %v3548_v60 = vpop.f32.mrb[3].mxu0 }
  0xf9   : > { %400 = vrot.lane.b32.xlu1 %v3435_v14, %s4081_s15  ;;  %v3552_v61 = vpack.i.bf16 %v3546_v59, %v3548_v60 }
  0xfb   : > { %392 = vrot.lane.b32.xlu0 %v3453_v18, %s4091_s16 }
  0xfd   : > { %411 = vrot.lane.b32.xlu1 %v3460_v19, %s3300_s19 }
  0xff   : > { %409 = vrot.lane.b32.xlu0 %v3467_v20, %s3300_s19 }
 0x167   : > { %v399_v21 = vpop.permute.xlu1 %398 }
 0x169   : > { %v391_v23 = vpop.permute.xlu0 %390 }
 0x16a   : > { %v405_v24 = vsel %vm404_vm1, %v391_v23, %v399_v21 }
 0x16b   : > { %v417_v25 = vmul.f32 %v405_v24, %v3474_v22  ;;  %v401_v27 = vpop.permute.xlu1 %400 }
 0x16d   : > { %421 = vrot.lane.b32.xlu0 %v417_v25, %s3300_s19  ;;  %v393_v28 = vpop.permute.xlu0 %392 }
 0x16e   : > { %v406_v29 = vsel %vm404_vm1, %v393_v28, %v401_v27 }
 0x16f   : > { %v418_v30 = vmul.f32 %v406_v29, %v3481_v26  ;;  %v412_v32 = vpop.permute.xlu1 %411 }
 0x170   : > { %v416_v35 = vmul.f32 %v3435_v14, %v412_v32 }
 0x171   : > { %423 = vrot.lane.b32.xlu1 %v418_v30, %s3300_s19  ;;  %v410_v31 = vpop.permute.xlu0 %409 }
 0x172   : > { %v415_v36 = vmul.f32 %v410_v31, %v3437_v15 }
 0x175   : > { %463 = vrot.lane.b32.xlu1 %v3442_v16, %s3301_s13 }
 0x179   : > { %465 = vrot.lane.b32.xlu1 %v3453_v18, %s3301_s13 }
 0x17d   : > { %688 = vrot.lane.b32.xlu1 %v3442_v16, %s3302_s14 }
 0x181   : > { %690 = vrot.lane.b32.xlu1 %v3453_v18, %s3302_s14 }
 0x185   : > { %696 = vrot.lane.b32.xlu1 %v3435_v14, %s3301_s13 }
 0x189   : > { %914 = vrot.lane.b32.xlu1 %v3442_v16, %s4089_s17 }
 0x18d   : > { %920 = vrot.lane.b32.xlu1 %v3437_v15, %s3302_s14 }
 0x1df   : > { %v422_v33 = vpop.permute.xlu0 %421 }
 0x1e0   : > { %v427_v39 = vadd.f32 %v422_v33, %v415_v36 }
 0x1e3   : > { %v424_v38 = vpop.permute.xlu1 %423 }
 0x1e4   : > { %v428_v40 = vadd.f32 %v424_v38, %v416_v35 }
 0x1e6   : > { %v3128_v41 = vpack.i.bf16 %v428_v40, %v427_v39 }
 0x1e7   : > { %v464_v45 = vpop.permute.xlu1 %463 }
 0x1e8   : > { %3129 = vrot.lane.b32.xlu0 %v3128_v41, %s3300_s19 }
 0x1eb   : > { %v466_v52 = vpop.permute.xlu1 %465 }
 0x1ec   : > { %469 = vrot.lane.b32.xlu0 %v3437_v15, %s3304_s18 }
 0x1ef   : > { %v689_v10 = vpop.permute.xlu1 %688 }
 0x1f0   : > { %471 = vrot.lane.b32.xlu0 %v3435_v14, %s3304_s18 }
 0x1f3   : > { %v691_v12 = vpop.permute.xlu1 %690 }
 0x1f4   : > { %429 = vrot.lane.b32.xlu0 %v3442_v16, %s3305_s20 }
 0x1f7   : > { %v697_v21 = vpop.permute.xlu1 %696 }
 0x1f8   : > { %431 = vrot.lane.b32.xlu0 %v3453_v18, %s3305_s20  ;;  %v701_v32 = vsel %vm404_vm1, %v691_v12, %v697_v21 }
 0x1f9   : > { %v711_v34 = vmul.f32 %v701_v32, %v3481_v26 }
 0x1fb   : > { %v915_v25 = vpop.permute.xlu1 %914 }
 0x1fc   : > { %435 = vrot.lane.b32.xlu0 %v3437_v15, %s4091_s16 }
 0x1ff   : > { %v921_v33 = vpop.permute.xlu1 %920 }
 0x200   : > { %437 = vrot.lane.b32.xlu0 %v3435_v14, %s4091_s16  ;;  %v926_v35 = vsel %vm404_vm1, %v915_v25, %v921_v33 }
 0x201   : > { %v936_v36 = vmul.f32 %v926_v35, %v3474_v22 }
 0x204   : > { %694 = vrot.lane.b32.xlu0 %v3437_v15, %s3301_s13 }
 0x25a   : > { %v3130_v42 = vpop.permute.xlu0 %3129 }
 0x25b   : > { %v3132_v43 = vunpack.i.h.bf16 %v3130_v42  ;;  %v3131_v44 = vunpack.i.l.bf16 %v3130_v42 }
 0x25d   : > { %v3528_v47 = vpack.c.bf16 %v3132_v43, %v3131_v44 }
 0x25e   : > { %v470_v48 = vpop.permute.xlu0 %469 }
 0x25f   : > { %v475_v49 = vsel %vm404_vm1, %v464_v45, %v470_v48  ;;  %2980 = vmatprep.subr.msk.bf16.mxu0 %vm3524_vm3, %v3528_v47 }
 0x260   : > { %v479_v51 = vmul.f32 %v475_v49, %v3474_v22  ;;  %2983 = vmatpush3.bf16.xpose.msk.msra.mxu0 %vm3524_vm3, %v3528_v47 }
 0x262   : > { %v481_v53 = vadd.f32 %v479_v51, %v477_v50  ;;  %v472_v54 = vpop.permute.xlu0 %471 }
 0x263   : > { %v476_v55 = vsel %vm404_vm1, %v466_v52, %v472_v54 }
 0x264   : > { %v480_v57 = vmul.f32 %v476_v55, %v3481_v26  ;;  %2832 = vmatprep.mubr.msk.f32.mxu0 %vm489_vm2, %v481_v53 }
 0x266   : > { %v482_v58 = vadd.f32 %v480_v57, %v478_v56  ;;  %v430_v8 = vpop.permute.xlu0 %429 }
 0x268   : > { %2833 = vmatmul.mubr.msk.f32.vlgmr.msra.gmra.mrb[4].mxu0 %vm489_vm2, %v482_v58 }
 0x26a   : > { %v432_v9 = vpop.permute.xlu0 %431 }
 0x26e   : > { %v436_v11 = vpop.permute.xlu0 %435 }
 0x26f   : > { %v441_v23 = vsel %vm404_vm1, %v430_v8, %v436_v11 }
 0x270   : > { %v451_v27 = vmul.f32 %v441_v23, %v3474_v22 }
 0x272   : > { %v438_v13 = vpop.permute.xlu0 %437 }
 0x273   : > { %v442_v28 = vsel %vm404_vm1, %v432_v9, %v438_v13 }
 0x274   : > { %v452_v30 = vmul.f32 %v442_v28, %v3481_v26 }
 0x276   : > { %v695_v24 = vpop.permute.xlu0 %694 }
 0x277   : > { %v700_v29 = vsel %vm404_vm1, %v689_v10, %v695_v24 }
 0x278   : > { %v710_v31 = vmul.f32 %v700_v29, %v3474_v22 }
 0x33b   : > { %v2834_v63 = vpop.f32.mrb[4].mxu0 }
 0x33c   : > { %v576_v1 = vmul.f32 0.25, %v2834_v63  ;;  %v566_v2 = vpop.f32.mrb[5].mxu0 }
 0x33d   : > { %v575_v3 = vmul.f32 0.25, %v566_v2 }
 0x33e   : > { %v3567_v4 = vadd.f32 %v576_v1, %v3561_v62 }
 0x33f   : > { %v3570_v5 = vadd.f32 %v575_v3, %v3564_v0 }
 0x340   : > { %v582_v6 = vsel %vm489_vm2, %v3567_v4, -inf }
 0x341   : > { %583 = vmax.xlane.f32.xlu0 %v582_v6  ;;  %v579_v7 = vsel %vm489_vm2, %v3570_v5, -inf }
 0x342   : > { %580 = vmax.xlane.f32.xlu1 %v579_v7 }
 0x353   : > { %916 = vrot.lane.b32.xlu1 %v3453_v18, %s4089_s17 }
 0x357   : > { %922 = vrot.lane.b32.xlu0 %v3435_v14, %s3302_s14  ;;  %443 = vrot.lane.b32.xlu1 %v3467_v20, %s4087_s26 }
 0x35b   : > { %445 = vrot.lane.b32.xlu0 %v3460_v19, %s4087_s26  ;;  %702 = vrot.lane.b32.xlu1 %v3467_v20, %s3307_s11 }
 0x35f   : > { %704 = vrot.lane.b32.xlu0 %v3460_v19, %s3307_s11  ;;  %455 = vrot.lane.b32.xlu1 %v451_v27, %s4087_s26 }
 0x363   : > { %457 = vrot.lane.b32.xlu0 %v452_v30, %s4087_s26  ;;  %714 = vrot.lane.b32.xlu1 %v710_v31, %s3307_s11 }
 0x367   : > { %716 = vrot.lane.b32.xlu0 %v711_v34, %s3307_s11  ;;  %928 = vrot.lane.b32.xlu1 %v3467_v20, %s3308_s12 }
 0x36b   : > { %940 = vrot.lane.b32.xlu1 %v936_v36, %s3308_s12  ;;  %930 = vrot.lane.b32.xlu0 %v3460_v19, %s3308_s12 }
 0x3ce   : > { %v584_v37 = vpop.xlane.xlu0 %583 }
 0x3cf   : > { %v581_v38 = vpop.xlane.xlu1 %580  ;;  %v586_v54 = vsub.f32 %v3567_v4, %v584_v37 }
 0x3d0   : > { %v585_v3 = vsub.f32 %v3570_v5, %v581_v38 }
 0x3d1   : > { %v589_v63 = vmul.f32 1.442695, %v586_v54 }
 0x3d2   : > { %v923_v39 = vpop.permute.xlu0 %922  ;;  %v587_v7 = vmul.f32 1.442695, %v585_v3 }
 0x3d3   : > { %v917_v40 = vpop.permute.xlu1 %916  ;;  %3168 = vpow2.f32 %v589_v63 }
 0x3d4   : > { %v927_v41 = vsel %vm404_vm1, %v917_v40, %v923_v39  ;;  %3170 = vpow2.f32 %v587_v7 }
 0x3d5   : > { %v937_v42 = vmul.f32 %v927_v41, %v3481_v26 }
 0x3d6   : > { %v446_v43 = vpop.permute.xlu0 %445 }
 0x3d7   : > { %942 = vrot.lane.b32.xlu0 %v937_v42, %s3308_s12  ;;  %v444_v44 = vpop.permute.xlu1 %443  ;;  %v450_v49 = vmul.f32 %v3435_v14, %v446_v43 }
 0x3d8   : > { %v449_v50 = vmul.f32 %v444_v44, %v3437_v15 }
 0x3da   : > { %v705_v45 = vpop.permute.xlu0 %704 }
 0x3db   : > { %v703_v48 = vpop.permute.xlu1 %702  ;;  %v709_v10 = vmul.f32 %v3435_v14, %v705_v45 }
 0x3dc   : > { %v708_v56 = vmul.f32 %v703_v48, %v3437_v15 }
 0x3dd   : > { %v3169_v2 = vpop.eup %3168 }
 0x3de   : > { %v458_v51 = vpop.permute.xlu0 %457  ;;  %v594_v6 = vsel %vm489_vm2, %v3169_v2, 0.0  ;;  %v3171_v4 = vpop.eup %3170 }
 0x3df   : > { %v462_v52 = vadd.f32 %v458_v51, %v450_v49  ;;  %v456_v53 = vpop.permute.xlu1 %455  ;;  %v591_v8 = vsel %vm489_vm2, %v3171_v4, 0.0 }
 0x3e0   : > { %v461_v55 = vadd.f32 %v456_v53, %v449_v50 }
 0x3e2   : > { %v3138_v57 = vpack.i.bf16 %v462_v52, %v461_v55  ;;  %v717_v9 = vpop.permute.xlu0 %716 }
 0x3e3   : > { %v715_v58 = vpop.permute.xlu1 %714  ;;  %v721_v11 = vadd.f32 %v717_v9, %v709_v10 }
 0x3e4   : > { %v720_v1 = vadd.f32 %v715_v58, %v708_v56 }
 0x3e6   : > { %724 = vrot.lane.b32.xlu1 %v720_v1, %s3309_s10  ;;  %v931_v23 = vpop.permute.xlu0 %930 }
 0x3e7   : > { %v929_v12 = vpop.permute.xlu1 %928  ;;  %v935_v24 = vmul.f32 %v3435_v14, %v931_v23 }
 0x3e8   : > { %v934_v13 = vmul.f32 %v929_v12, %v3437_v15 }
 0x3eb   : > { %v941_v5 = vpop.permute.xlu1 %940 }
 0x3ec   : > { %v946_v21 = vadd.f32 %v941_v5, %v934_v13 }
 0x3f6   : > { %595 = vadd.xlane.f32.xlu0 %v594_v6 }
 0x40a   : > { %592 = vadd.xlane.f32.xlu1 %v591_v8 }
 0x40c   : > { %3134 = vrot.lane.b32.xlu0 %v3446_v17, %s3308_s12 }
 0x410   : > { %726 = vrot.lane.b32.xlu0 %v721_v11, %s3309_s10 }
 0x41b   : > { %3139 = vrot.lane.b32.xlu1 %v3138_v57, %s4085_s28 }
 0x41f   : > { %950 = vrot.lane.b32.xlu1 %v946_v21, %s4083_s29 }
 0x423   : > { %1162 = vrot.lane.b32.xlu1 %v3437_v15, %s4089_s17 }
 0x449   : > { %v943_v25 = vpop.permute.xlu0 %942 }
 0x44a   : > { %v947_v27 = vadd.f32 %v943_v25, %v935_v24 }
 0x44c   : > { %952 = vrot.lane.b32.xlu0 %v947_v27, %s4083_s29 }
 0x450   : > { %1156 = vrot.lane.b32.xlu0 %v3442_v16, %s4081_s15 }
 0x458   : > { %v725_v33 = vpop.permute.xlu1 %724 }
 0x483   : > { %v596_v28 = vpop.xlane.xlu0 %595 }
 0x484   : > { %3172 = vrcp.f32 %v596_v28 }
 0x487   : > { %v3135_v29 = vpop.permute.xlu0 %3134 }
 0x488   : > { %v3137_v30 = vunpack.i.h.bf16 %v3135_v29  ;;  %v3136_v31 = vunpack.i.l.bf16 %v3135_v29 }
 0x48a   : > { %v2984_v32 = vpack.c.bf16 %v3137_v30, %v3136_v31 }
 0x48b   : > { %v727_v42 = vpop.permute.xlu0 %726 }
 0x48c   : > { %2985 = vmatprep.subr.bf16.mxu1 %v2984_v32  ;;  %2995 = vmatprep.subr.bf16.mxu0 %v2984_v32 }
 0x48d   : > { %2987 = vmatpush3.bf16.msra.mxu1 %v2984_v32  ;;  %2997 = vmatpush3.bf16.msra.mxu0 %v2984_v32 }
 0x48e   : > { %2990 = vmatprep.subr.msk.bf16.mxu1 %vm3524_vm3, %v3528_v47  ;;  %v3173_v36 = vpop.eup %3172 }
 0x48f   : > { %v600_v40 = vmul.f32 %v3173_v36, %v3169_v2 }
 0x497   : > { %v593_v34 = vpop.xlane.xlu1 %592 }
 0x498   : > { %3174 = vrcp.f32 %v593_v34 }
 0x49b   : > { %v3140_v35 = vpop.permute.xlu1 %3139 }
 0x49c   : > { %v3142_v37 = vunpack.i.h.bf16 %v3140_v35  ;;  %v3141_v38 = vunpack.i.l.bf16 %v3140_v35 }
 0x49e   : > { %v3635_v41 = vpack.c.bf16 %v3142_v37, %v3141_v38 }
 0x49f   : > { %v951_v43 = vpop.permute.xlu1 %950 }
 0x4a2   : > { %v3175_v16 = vpop.eup %3174 }
 0x4a3   : > { %v598_v39 = vmul.f32 %v3175_v16, %v3171_v4  ;;  %v1163_v4 = vpop.permute.xlu1 %1162 }
 0x4a5   : > { %2839 = vmatprep.mubr.msk.f32.mxu1 %vm489_vm2, %v598_v39 }
 0x4a6   : > { %2840 = vmatmul.mubr.msk.f32.vlgmr.msra.gmra.mrb[0].mxu1 %vm489_vm2, %v600_v40  ;;  %v3686_v40 = vsub.f32 0.0, %v3548_v60 }
 0x4a7   : > { %2993 = vmatpush3.bf16.xpose.msk.msra.mxu1 %vm3524_vm3, %v3528_v47  ;;  %2846 = vmatprep.mubr.msk.f32.mxu1 %vm489_vm2, %v725_v33 }
 0x4a8   : > { %3000 = vmatprep.subr.msk.bf16.mxu1 %vm3524_vm3, %v3635_v41 }
 0x4ae   : > { %2847 = vmatmul.mubr.msk.f32.vlgmr.msra.gmra.mrb[2].mxu1 %vm489_vm2, %v727_v42 }
 0x4af   : > { %3003 = vmatpush3.bf16.xpose.msk.msra.mxu1 %vm3524_vm3, %v3635_v41  ;;  %2860 = vmatprep.mubr.msk.f32.mxu1 %vm489_vm2, %v951_v43 }
 0x4be   : > { %v953_v44 = vpop.permute.xlu0 %952 }
 0x4bf   : > { %2861 = vmatmul.mubr.msk.f32.vlgmr.msra.gmra.mrb[4].mxu1 %vm489_vm2, %v953_v44 }
 0x4c2   : > { %v1157_v7 = vpop.permute.xlu0 %1156 }
 0x4c3   : > { %v1168_v8 = vsel %vm404_vm1, %v1157_v7, %v1163_v4 }
 0x4c4   : > { %v1178_v9 = vmul.f32 %v1168_v8, %v3474_v22 }
 0x579   : > { %v3651_v47 = vpop.f32.mrb[0].mxu1 }
 0x57a   : > { %v3653_v45 = vpop.f32.mrb[1].mxu1 }
 0x581   : > { %v2848_v48 = vpop.f32.mrb[2].mxu1 }
 0x582   : > { %v808_v49 = vmul.f32 0.25, %v2848_v48  ;;  %v798_v50 = vpop.f32.mrb[3].mxu1  ;;  %v3695_v48 = vsub.f32 0.0, %v3546_v59 }
 0x583   : > { %v807_v51 = vmul.f32 0.25, %v798_v50 }
 0x584   : > { %v810_v52 = vadd.f32 %v808_v49, %v3561_v62 }
 0x585   : > { %v809_v53 = vadd.f32 %v807_v51, %v3564_v0 }
 0x586   : > { %v814_v54 = vsel %vm489_vm2, %v810_v52, -inf }
 0x587   : > { %815 = vmax.xlane.f32.xlu0 %v814_v54  ;;  %v811_v55 = vsel %vm489_vm2, %v809_v53, -inf }
 0x588   : > { %812 = vmax.xlane.f32.xlu1 %v811_v55 }
 0x592   : > { %v2862_v56 = vpop.f32.mrb[4].mxu1 }
 0x593   : > { %v1044_v57 = vmul.f32 0.25, %v2862_v56  ;;  %v1034_v58 = vpop.f32.mrb[5].mxu1 }
 0x594   : > { %v1043_v63 = vmul.f32 0.25, %v1034_v58 }
 0x595   : > { %v1046_v1 = vadd.f32 %v1044_v57, %v3561_v62 }
 0x596   : > { %v1045_v2 = vadd.f32 %v1043_v63, %v3564_v0 }
 0x597   : > { %v1050_v3 = vsel %vm489_vm2, %v1046_v1, -inf }
 0x598   : > { %1051 = vmax.xlane.f32.xlu1 %v1050_v3  ;;  %v1047_v6 = vsel %vm489_vm2, %v1045_v2, -inf }
 0x599   : > { %1048 = vmax.xlane.f32.xlu0 %v1047_v6 }
 0x5a9   : > { %1158 = vrot.lane.b32.xlu1 %v3453_v18, %s4081_s15 }
 0x5ad   : > { %1170 = vrot.lane.b32.xlu1 %v3467_v20, %s4085_s28 }
 0x5af   : > { %1164 = vrot.lane.b32.xlu0 %v3435_v14, %s4089_s17  ;;  %s4101_s17 = smov 96  }
 0x5b1   : > { %1182 = vrot.lane.b32.xlu1 %v1178_v9, %s4085_s28 }
 0x5b3   : > { %1172 = vrot.lane.b32.xlu0 %v3460_v19, %s4085_s28 }
 0x614   : > { %v816_v18 = vpop.xlane.xlu0 %815 }
 0x615   : > { %v813_v10 = vpop.xlane.xlu1 %812  ;;  %v818_v30 = vsub.f32 %v810_v52, %v816_v18 }
 0x616   : > { %v817_v11 = vsub.f32 %v809_v53, %v813_v10 }
 0x617   : > { %v821_v31 = vmul.f32 1.442695, %v818_v30  ;;  %v3743_v30 = vld [vmem:[%s4078_s4 + $0x10] sm:$0xff] }
 0x618   : > { %v819_v12 = vmul.f32 1.442695, %v817_v11 }
 0x61a   : > { %3176 = vpow2.f32 %v819_v12 }
 0x624   : > { %v3177_v5 = vpop.eup %3176 }
 0x625   : > { %v823_v13 = vsel %vm489_vm2, %v3177_v5, 0.0  ;;  %v1052_v21 = vpop.xlane.xlu1 %1051 }
 0x626   : > { %824 = vadd.xlane.f32.xlu1 %v823_v13  ;;  %v1054_v20 = vsub.f32 %v1046_v1, %v1052_v21  ;;  %v1049_v22 = vpop.xlane.xlu0 %1048 }
 0x627   : > { %v1053_v32 = vsub.f32 %v1045_v2, %v1049_v22 }
 0x628   : > { %v1057_v23 = vmul.f32 1.442695, %v1054_v20 }
 0x629   : > { %v1159_v24 = vpop.permute.xlu1 %1158  ;;  %v1055_v34 = vmul.f32 1.442695, %v1053_v32  ;;  %v3749_v32 = vld [vmem:[%s4077_s3 + $0x10] sm:$0xff] }
 0x62a   : > { %3178 = vpow2.f32 %v1057_v23  ;;  %v1165_v25 = vpop.permute.xlu0 %1164 }
 0x62b   : > { %v1169_v27 = vsel %vm404_vm1, %v1159_v24, %v1165_v25  ;;  %3180 = vpow2.f32 %v821_v31  ;;  %v3728_v25 = vld [vmem:[%s4078_s4 + $0x18] sm:$0xff] }
 0x62c   : > { %v1179_v19 = vmul.f32 %v1169_v27, %v3481_v26  ;;  %3182 = vpow2.f32 %v1055_v34 }
 0x62d   : > { %v1171_v33 = vpop.permute.xlu1 %1170 }
 0x62e   : > { %1184 = vrot.lane.b32.xlu0 %v1179_v19, %s4085_s28  ;;  %v1176_v36 = vmul.f32 %v1171_v33, %v3437_v15  ;;  %v1173_v15 = vpop.permute.xlu0 %1172  ;;  %v3734_v19 = vld [vmem:[%s4077_s3 + $0x18] sm:$0xff]  ;;  %s257_s28 = sand.u32 1, %s3288_s22  }
 0x62f   : > { %v1177_v42 = vmul.f32 %v3435_v14, %v1173_v15 }
 0x631   : > { %v1183_v35 = vpop.permute.xlu1 %1182 }
 0x632   : > { %v1188_v16 = vadd.f32 %v1183_v35, %v1176_v36 }
 0x634   : > { %v3179_v28 = vpop.eup %3178 }
 0x635   : > { %v1062_v29 = vsel %vm489_vm2, %v3179_v28, 0.0  ;;  %v3181_v26 = vpop.eup %3180 }
 0x636   : > { %1063 = vadd.xlane.f32.xlu1 %v1062_v29  ;;  %v826_v37 = vsel %vm489_vm2, %v3181_v26, 0.0  ;;  %v3183_v38 = vpop.eup %3182 }
 0x637   : > { %v1059_v39 = vsel %vm489_vm2, %v3183_v38, 0.0 }
 0x647   : > { %1192 = vrot.lane.b32.xlu1 %v1188_v16, %s4087_s26 }
 0x64d   : > { %827 = vadd.xlane.f32.xlu0 %v826_v37 }
 0x651   : > { %1060 = vadd.xlane.f32.xlu0 %v1059_v39 }
 0x667   : > { %3144 = vrot.lane.b32.xlu0 %v3446_v17, %s3307_s11 }
 0x66b   : > { %1424 = vrot.lane.b32.xlu0 %v3686_v40, %s4091_s16 }
 0x66f   : > { %1432 = vrot.lane.b32.xlu0 %v3548_v60, %s4081_s15 }
 0x6a0   : > { %v1185_v43 = vpop.permute.xlu0 %1184 }
 0x6a1   : > { %v1189_v44 = vadd.f32 %v1185_v43, %v1177_v42 }
 0x6a3   : > { %1194 = vrot.lane.b32.xlu1 %v1189_v44, %s4087_s26 }
 0x6a7   : > { %1426 = vrot.lane.b32.xlu1 %v3695_v48, %s4091_s16  ;;  %s4097_s16 = smov 56  }
 0x6ab   : > { %1434 = vrot.lane.b32.xlu1 %v3546_v59, %s4081_s15  ;;  %s2645_s15 = sshll.u32 %s257_s28, 5 }
 0x6ac   : > { %s259_s29 = scalar_lea.vmem [#allocation2], %s2645_s15 }
 0x6b3   : > { %v825_v17 = vpop.xlane.xlu1 %824 }
 0x6b4   : > { %3184 = vrcp.f32 %v825_v17 }
 0x6be   : > { %v3185_v49 = vpop.eup %3184 }
 0x6bf   : > { %v830_v50 = vmul.f32 %v3185_v49, %v3177_v5 }
 0x6c1   : > { %2853 = vmatprep.mubr.msk.f32.mxu0 %vm489_vm2, %v830_v50 }
 0x6c3   : > { %v1064_v51 = vpop.xlane.xlu1 %1063 }
 0x6c7   : > { %v1193_v6 = vpop.permute.xlu1 %1192 }
 0x6da   : > { %v828_v14 = vpop.xlane.xlu0 %827 }
 0x6db   : > { %3186 = vrcp.f32 %v828_v14 }
 0x6dc   : > { %3188 = vrcp.f32 %v1064_v51 }
 0x6de   : > { %v1061_v52 = vpop.xlane.xlu0 %1060 }
 0x6df   : > { %3190 = vrcp.f32 %v1061_v52 }
 0x6e2   : > { %v3145_v53 = vpop.permute.xlu0 %3144 }
 0x6e3   : > { %v3147_v54 = vunpack.i.h.bf16 %v3145_v53  ;;  %v3146_v55 = vunpack.i.l.bf16 %v3145_v53 }
 0x6e5   : > { %v3187_v56 = vpop.eup %3186  ;;  %v3004_v57 = vpack.c.bf16 %v3147_v54, %v3146_v55 }
 0x6e6   : > { %v832_v58 = vmul.f32 %v3187_v56, %v3181_v26  ;;  %v3189_v63 = vpop.eup %3188  ;;  %v1425_v23 = vpop.permute.xlu0 %1424 }
 0x6e7   : > { %3005 = vmatprep.subr.bf16.mxu0 %v3004_v57  ;;  %3015 = vmatprep.subr.bf16.mxu1 %v3004_v57  ;;  %v1068_v3 = vmul.f32 %v3189_v63, %v3179_v28 }
 0x6e8   : > { %2854 = vmatmul.mubr.msk.f32.vlgmr.msra.gmra.mrb[6].mxu0 %vm489_vm2, %v832_v58  ;;  %3017 = vmatpush3.bf16.msra.mxu1 %v3004_v57 }
 0x6e9   : > { %v3191_v1 = vpop.eup %3190  ;;  %3007 = vmatpush3.bf16.msra.mxu0 %v3004_v57 }
 0x6ea   : > { %3010 = vmatprep.subr.msk.bf16.mxu0 %vm3524_vm3, %v3635_v41  ;;  %v1066_v2 = vmul.f32 %v3191_v1, %v3183_v38  ;;  %v1433_v28 = vpop.permute.xlu0 %1432 }
 0x6eb   : > { %v1438_v31 = vsel %vm404_vm1, %v1425_v23, %v1433_v28  ;;  %v1511_v23 = vmul.f32 %v3546_v59, %v3734_v19 }
 0x6ec   : > { %2867 = vmatprep.mubr.msk.f32.mxu0 %vm489_vm2, %v1066_v2  ;;  %v1450_v33 = vmul.f32 %v3743_v30, %v1438_v31 }
 0x6ed   : > { %2868 = vmatmul.mubr.msk.f32.vlgmr.msra.gmra.mrb[8].mxu0 %vm489_vm2, %v1068_v3 }
 0x6ee   : > { %2874 = vmatprep.mubr.msk.f32.mxu0 %vm489_vm2, %v1193_v6 }
 0x6f2   : > { %3013 = vmatpush3.bf16.xpose.msk.msra.mxu0 %vm3524_vm3, %v3635_v41 }
 0x715   : > { %v1195_v7 = vpop.permute.xlu1 %1194 }
 0x716   : > { %2875 = vmatmul.mubr.msk.f32.vlgmr.msra.gmra.mrb[10].mxu0 %vm489_vm2, %v1195_v7 }
 0x719   : > { %v1427_v22 = vpop.permute.xlu1 %1426 }
 0x71d   : > { %v1435_v24 = vpop.permute.xlu1 %1434 }
 0x71e   : > { %v1439_v27 = vsel %vm404_vm1, %v1427_v22, %v1435_v24 }
 0x71f   : > { %v1451_v29 = vmul.f32 %v3728_v25, %v1439_v27 }
 0x7bb   : > { %v3713_v4 = vpop.f32.mrb[6].mxu0 }
 0x7bc   : > { %v3715_v8 = vpop.f32.mrb[7].mxu0 }
 0x7c0   : > { %v3717_v9 = vpop.f32.mrb[8].mxu0 }
 0x7c1   : > { %v3719_v10 = vpop.f32.mrb[9].mxu0 }
 0x7e9   : > { %v2876_v11 = vpop.f32.mrb[10].mxu0 }
 0x7ea   : > { %v1276_v12 = vmul.f32 0.25, %v2876_v11  ;;  %v1266_v18 = vpop.f32.mrb[11].mxu0 }
 0x7eb   : > { %v1275_v5 = vmul.f32 0.25, %v1266_v18  ;;  %v1510_v18 = vmul.f32 %v3749_v32, %v3548_v60 }
 0x7ec   : > { %v1278_v13 = vadd.f32 %v1276_v12, %v3561_v62 }
 0x7ed   : > { %v1277_v21 = vadd.f32 %v1275_v5, %v3564_v0 }
 0x7ee   : > { %v1282_v41 = vsel %vm489_vm2, %v1278_v13, -inf }
 0x7ef   : > { %1283 = vmax.xlane.f32.xlu1 %v1282_v41  ;;  %v1279_v20 = vsel %vm489_vm2, %v1277_v21, -inf }
 0x7f0   : > { %1280 = vmax.xlane.f32.xlu0 %v1279_v20 }
 0x800   : > { %1444 = vrot.lane.b32.xlu1 %v3734_v19, %s3300_s19 }
 0x804   : > { %1456 = vrot.lane.b32.xlu1 %v1451_v29, %s3300_s19 }
 0x806   : > { %1442 = vrot.lane.b32.xlu0 %v3749_v32, %s3300_s19 }
 0x808   : > { %1496 = vrot.lane.b32.xlu1 %v3686_v40, %s3301_s13 }
 0x80a   : > { %1454 = vrot.lane.b32.xlu0 %v1450_v33, %s3300_s19 }
 0x87c   : > { %v1284_v34 = vpop.xlane.xlu1 %1283 }
 0x87d   : > { %v1286_v35 = vsub.f32 %v1278_v13, %v1284_v34  ;;  %v1281_v36 = vpop.xlane.xlu0 %1280 }
 0x87e   : > { %v1285_v14 = vsub.f32 %v1277_v21, %v1281_v36 }
 0x87f   : > { %v1289_v16 = vmul.f32 1.442695, %v1286_v35 }
 0x880   : > { %v1445_v26 = vpop.permute.xlu1 %1444  ;;  %v1287_v51 = vmul.f32 1.442695, %v1285_v14 }
 0x881   : > { %3192 = vpow2.f32 %v1289_v16  ;;  %v1443_v37 = vpop.permute.xlu0 %1442  ;;  %v1449_v38 = vmul.f32 %v3546_v59, %v1445_v26 }
 0x882   : > { %v1448_v39 = vmul.f32 %v1443_v37, %v3548_v60  ;;  %3194 = vpow2.f32 %v1287_v51 }
 0x884   : > { %v1457_v15 = vpop.permute.xlu1 %1456 }
 0x885   : > { %v1461_v42 = vadd.f32 %v1457_v15, %v1449_v38  ;;  %v1455_v43 = vpop.permute.xlu0 %1454 }
 0x886   : > { %v1460_v44 = vadd.f32 %v1455_v43, %v1448_v39 }
 0x888   : > { %v3148_v17 = vpack.i.bf16 %v1461_v42, %v1460_v44  ;;  %v1497_v58 = vpop.permute.xlu1 %1496 }
 0x88a   : > { %3149 = vrot.lane.b32.xlu0 %v3148_v17, %s3300_s19  ;;  %s4098_s19 = smov 88  }
 0x88b   : > { %v3193_v49 = vpop.eup %3192 }
 0x88c   : > { %v1294_v50 = vsel %vm489_vm2, %v3193_v49, 0.0  ;;  %v3195_v52 = vpop.eup %3194 }
 0x88d   : > { %1295 = vadd.xlane.f32.xlu1 %v1294_v50  ;;  %v1291_v53 = vsel %vm489_vm2, %v3195_v52, 0.0 }
 0x88e   : > { %1502 = vrot.lane.b32.xlu0 %v3548_v60, %s3304_s18 }
 0x89e   : > { %1498 = vrot.lane.b32.xlu1 %v3695_v48, %s3301_s13 }
 0x8a2   : > { %1726 = vrot.lane.b32.xlu1 %v3548_v60, %s3301_s13 }
 0x8ad   : > { %1292 = vadd.xlane.f32.xlu0 %v1291_v53 }
 0x8c3   : > { %1504 = vrot.lane.b32.xlu0 %v3546_v59, %s3304_s18 }
 0x8c7   : > { %1720 = vrot.lane.b32.xlu0 %v3686_v40, %s3302_s14 }
 0x8fc   : > { %v3150_v54 = vpop.permute.xlu0 %3149 }
 0x8fd   : > { %v3152_v55 = vunpack.i.h.bf16 %v3150_v54  ;;  %v3151_v56 = vunpack.i.l.bf16 %v3150_v54 }
 0x8ff   : > { %v3772_v57 = vpack.c.bf16 %v3152_v55, %v3151_v56 }
 0x900   : > { %v1503_v63 = vpop.permute.xlu0 %1502 }
 0x901   : > { %3020 = vmatprep.subr.msk.bf16.mxu1 %vm3524_vm3, %v3772_v57  ;;  %v1508_v3 = vsel %vm404_vm1, %v1497_v58, %v1503_v63 }
 0x902   : > { %v1512_v7 = vmul.f32 %v3743_v30, %v1508_v3 }
 0x904   : > { %v1514_v41 = vadd.f32 %v1512_v7, %v1510_v18 }
 0x91a   : > { %v1296_v1 = vpop.xlane.xlu1 %1295 }
 0x91b   : > { %3196 = vrcp.f32 %v1296_v1 }
 0x91e   : > { %v1499_v21 = vpop.permute.xlu1 %1498 }
 0x922   : > { %v1727_v38 = vpop.permute.xlu1 %1726 }
 0x925   : > { %v3197_v6 = vpop.eup %3196 }
 0x926   : > { %v1300_v13 = vmul.f32 %v3197_v6, %v3193_v49 }
 0x93a   : > { %v1293_v2 = vpop.xlane.xlu0 %1292 }
 0x93b   : > { %3198 = vrcp.f32 %v1293_v2 }
 0x93e   : > { %v1505_v12 = vpop.permute.xlu0 %1504 }
 0x93f   : > { %v1509_v20 = vsel %vm404_vm1, %v1499_v21, %v1505_v12 }
 0x940   : > { %v1513_v22 = vmul.f32 %v3728_v25, %v1509_v20 }
 0x942   : > { %v1515_v24 = vadd.f32 %v1513_v22, %v1511_v23  ;;  %v1721_v37 = vpop.permute.xlu0 %1720 }
 0x943   : > { %v1732_v39 = vsel %vm404_vm1, %v1721_v37, %v1727_v38 }
 0x944   : > { %v1742_v15 = vmul.f32 %v3743_v30, %v1732_v39 }
 0x945   : > { %v3199_v11 = vpop.eup %3198 }
 0x946   : > { %v1298_v5 = vmul.f32 %v3199_v11, %v3195_v52 }
 0x948   : > { %2881 = vmatprep.mubr.msk.f32.mxu1 %vm489_vm2, %v1298_v5 }
 0x949   : > { %2882 = vmatmul.mubr.msk.f32.vlgmr.msra.gmra.mrb[6].mxu1 %vm489_vm2, %v1300_v13 }
 0x94a   : > { %3023 = vmatpush3.bf16.xpose.msk.msra.mxu1 %vm3524_vm3, %v3772_v57  ;;  %2888 = vmatprep.mubr.msk.f32.mxu1 %vm489_vm2, %v1514_v41 }
 0x951   : > { %2889 = vmatmul.mubr.msk.f32.vlgmr.msra.gmra.mrb[8].mxu1 %vm489_vm2, %v1515_v24 }
 0xa1c   : > { %v3792_v27 = vpop.f32.mrb[6].mxu1 }
 0xa1d   : > { %v3794_v28 = vpop.f32.mrb[7].mxu1 }
 0xa24   : > { %v2890_v29 = vpop.f32.mrb[8].mxu1 }
 0xa25   : > { %v1608_v31 = vmul.f32 0.25, %v2890_v29  ;;  %v1598_v33 = vpop.f32.mrb[9].mxu1 }
 0xa26   : > { %v1607_v34 = vmul.f32 0.25, %v1598_v33 }
 0xa27   : > { %v1610_v35 = vadd.f32 %v1608_v31, %v3561_v62 }
 0xa28   : > { %v1609_v36 = vadd.f32 %v1607_v34, %v3564_v0 }
 0xa29   : > { %v1614_v16 = vsel %vm489_vm2, %v1610_v35, -inf }
 0xa2a   : > { %1615 = vmax.xlane.f32.xlu0 %v1614_v16  ;;  %v1611_v26 = vsel %vm489_vm2, %v1609_v36, -inf }
 0xa2b   : > { %1612 = vmax.xlane.f32.xlu1 %v1611_v26 }
 0xa3c   : > { %1722 = vrot.lane.b32.xlu1 %v3695_v48, %s3302_s14 }
 0xa40   : > { %1728 = vrot.lane.b32.xlu0 %v3546_v59, %s3301_s13  ;;  %1734 = vrot.lane.b32.xlu1 %v3749_v32, %s3307_s11  ;;  %s4099_s13 = smov 80  }
 0xa44   : > { %1746 = vrot.lane.b32.xlu1 %v1742_v15, %s3307_s11  ;;  %1736 = vrot.lane.b32.xlu0 %v3734_v19, %s3307_s11 }
 0xab7   : > { %v1616_v42 = vpop.xlane.xlu0 %1615 }
 0xab8   : > { %v1613_v43 = vpop.xlane.xlu1 %1612  ;;  %v1618_v54 = vsub.f32 %v1610_v35, %v1616_v42 }
 0xab9   : > { %v1617_v56 = vsub.f32 %v1609_v36, %v1613_v43 }
 0xaba   : > { %v1621_v55 = vmul.f32 1.442695, %v1618_v54 }
 0xabb   : > { %v1729_v44 = vpop.permute.xlu0 %1728  ;;  %v1619_v58 = vmul.f32 1.442695, %v1617_v56 }
 0xabc   : > { %v1723_v17 = vpop.permute.xlu1 %1722  ;;  %3200 = vpow2.f32 %v1621_v55 }
 0xabd   : > { %v1733_v49 = vsel %vm404_vm1, %v1723_v17, %v1729_v44  ;;  %3202 = vpow2.f32 %v1619_v58 }
 0xabe   : > { %v1743_v50 = vmul.f32 %v3728_v25, %v1733_v49 }
 0xabf   : > { %v1737_v6 = vpop.permute.xlu0 %1736 }
 0xac0   : > { %1748 = vrot.lane.b32.xlu0 %v1743_v50, %s3307_s11  ;;  %v1735_v14 = vpop.permute.xlu1 %1734  ;;  %v1741_v7 = vmul.f32 %v3546_v59, %v1737_v6 }
 0xac1   : > { %v1740_v51 = vmul.f32 %v1735_v14, %v3548_v60 }
 0xac4   : > { %v1747_v52 = vpop.permute.xlu1 %1746 }
 0xac5   : > { %v1752_v53 = vadd.f32 %v1747_v52, %v1740_v51 }
 0xac6   : > { %v3201_v63 = vpop.eup %3200 }
 0xac7   : > { %1756 = vrot.lane.b32.xlu1 %v1752_v53, %s3309_s10  ;;  %v1626_v1 = vsel %vm489_vm2, %v3201_v63, 0.0  ;;  %v3203_v2 = vpop.eup %3202 }
 0xac8   : > { %v1623_v3 = vsel %vm489_vm2, %v3203_v2, 0.0 }
 0xadf   : > { %1627 = vadd.xlane.f32.xlu0 %v1626_v1 }
 0xaeb   : > { %1624 = vadd.xlane.f32.xlu1 %v1623_v3 }
 0xaf5   : > { %3154 = vrot.lane.b32.xlu0 %v3552_v61, %s3308_s12 }
 0xaf9   : > { %1462 = vrot.lane.b32.xlu0 %v3686_v40, %s3305_s20 }
 0xafd   : > { %1468 = vrot.lane.b32.xlu0 %v3548_v60, %s4097_s16 }
 0xb01   : > { %1946 = vrot.lane.b32.xlu0 %v3686_v40, %s4098_s19 }
 0xb32   : > { %v1749_v11 = vpop.permute.xlu0 %1748 }
 0xb33   : > { %v1753_v12 = vadd.f32 %v1749_v11, %v1741_v7 }
 0xb35   : > { %1758 = vrot.lane.b32.xlu1 %v1753_v12, %s3309_s10 }
 0xb39   : > { %1464 = vrot.lane.b32.xlu1 %v3695_v48, %s3305_s20  ;;  %v1757_v20 = vpop.permute.xlu1 %1756  ;;  %s4102_s20 = smov 72  }
 0xb3d   : > { %1470 = vrot.lane.b32.xlu1 %v3546_v59, %s4097_s16  ;;  %s2717_s16 = sshll.u32 %s3370_s25, 9  ;;  %s3312_s25 = smov [#allocation2]  }
 0xb41   : > { %1952 = vrot.lane.b32.xlu1 %v3548_v60, %s3302_s14 }
 0xb6c   : > { %v1628_v18 = vpop.xlane.xlu0 %1627 }
 0xb6d   : > { %3204 = vrcp.f32 %v1628_v18 }
 0xb70   : > { %v3155_v5 = vpop.permute.xlu0 %3154 }
 0xb71   : > { %v3157_v13 = vunpack.i.h.bf16 %v3155_v5  ;;  %v3156_v21 = vunpack.i.l.bf16 %v3155_v5 }
 0xb73   : > { %v3024_v41 = vpack.c.bf16 %v3157_v13, %v3156_v21 }
 0xb74   : > { %v1463_v43 = vpop.permute.xlu0 %1462 }
 0xb75   : > { %3025 = vmatprep.subr.bf16.mxu0 %v3024_v41  ;;  %3035 = vmatprep.subr.bf16.mxu1 %v3024_v41 }
 0xb76   : > { %3027 = vmatpush3.bf16.msra.mxu0 %v3024_v41  ;;  %3037 = vmatpush3.bf16.msra.mxu1 %v3024_v41 }
 0xb77   : > { %3030 = vmatprep.subr.msk.bf16.mxu0 %vm3524_vm3, %v3772_v57  ;;  %v3205_v23 = vpop.eup %3204 }
 0xb78   : > { %v1625_v22 = vpop.xlane.xlu1 %1624  ;;  %v1632_v31 = vmul.f32 %v3205_v23, %v3201_v63 }
 0xb79   : > { %3206 = vrcp.f32 %v1625_v22 }
 0xb83   : > { %v3207_v24 = vpop.eup %3206 }
 0xb84   : > { %v1630_v29 = vmul.f32 %v3207_v24, %v3203_v2 }
 0xb86   : > { %2895 = vmatprep.mubr.msk.f32.mxu0 %vm489_vm2, %v1630_v29 }
 0xb87   : > { %2896 = vmatmul.mubr.msk.f32.vlgmr.msra.gmra.mrb[12].mxu0 %vm489_vm2, %v1632_v31 }
 0xb88   : > { %3033 = vmatpush3.bf16.xpose.msk.msra.mxu0 %vm3524_vm3, %v3772_v57  ;;  %2902 = vmatprep.mubr.msk.f32.mxu0 %vm489_vm2, %v1757_v20 }
 0xba7   : > { %v1759_v33 = vpop.permute.xlu1 %1758 }
 0xba8   : > { %2903 = vmatmul.mubr.msk.f32.vlgmr.msra.gmra.mrb[14].mxu0 %vm489_vm2, %v1759_v33 }
 0xbab   : > { %v1465_v42 = vpop.permute.xlu1 %1464 }
 0xbaf   : > { %v1471_v44 = vpop.permute.xlu1 %1470 }
 0xbb0   : > { %v1475_v17 = vsel %vm404_vm1, %v1465_v42, %v1471_v44 }
 0xbb3   : > { %v1953_v14 = vpop.permute.xlu1 %1952 }
 0xc5a   : > { %v3844_v34 = vpop.f32.mrb[12].mxu0 }
 0xc5b   : > { %v3846_v35 = vpop.f32.mrb[13].mxu0 }
 0xc7b   : > { %v2904_v36 = vpop.f32.mrb[14].mxu0 }
 0xc7c   : > { %v1840_v16 = vmul.f32 0.25, %v2904_v36  ;;  %v1830_v26 = vpop.f32.mrb[15].mxu0 }
 0xc7d   : > { %v1839_v37 = vmul.f32 0.25, %v1830_v26 }
 0xc7e   : > { %v1842_v38 = vadd.f32 %v1840_v16, %v3561_v62  ;;  %v1469_v62 = vpop.permute.xlu0 %1468 }
 0xc7f   : > { %v1841_v39 = vadd.f32 %v1839_v37, %v3564_v0  ;;  %v1485_v0 = vmul.f32 %v3728_v25, %v1475_v17  ;;  %v1474_v49 = vsel %vm404_vm1, %v1463_v43, %v1469_v62 }
 0xc80   : > { %v1846_v15 = vsel %vm489_vm2, %v1842_v38, -inf  ;;  %v1484_v50 = vmul.f32 %v3743_v30, %v1474_v49 }
 0xc81   : > { %1847 = vmax.xlane.f32.xlu1 %v1846_v15  ;;  %v1843_v57 = vsel %vm489_vm2, %v1841_v39, -inf }
 0xc82   : > { %1844 = vmax.xlane.f32.xlu0 %v1843_v57  ;;  %v1947_v51 = vpop.permute.xlu0 %1946 }
 0xc83   : > { %v1958_v52 = vsel %vm404_vm1, %v1947_v51, %v1953_v14 }
 0xc84   : > { %v1968_v53 = vmul.f32 %v3743_v30, %v1958_v52 }
 0xc92   : > { %1954 = vrot.lane.b32.xlu1 %v3546_v59, %s3302_s14  ;;  %s4100_s14 = smov 48  }
 0xc96   : > { %1478 = vrot.lane.b32.xlu1 %v3734_v19, %s4099_s13 }
 0xc98   : > { %1948 = vrot.lane.b32.xlu0 %v3695_v48, %s4098_s19 }
 0xc9a   : > { %1490 = vrot.lane.b32.xlu1 %v1485_v0, %s4099_s13 }
 0xc9c   : > { %1476 = vrot.lane.b32.xlu0 %v3749_v32, %s4099_s13 }
 0xc9e   : > { %1962 = vrot.lane.b32.xlu1 %v3734_v19, %s3308_s12 }
 0xca0   : > { %1488 = vrot.lane.b32.xlu0 %v1484_v50, %s4099_s13 }
 0xca4   : > { %1960 = vrot.lane.b32.xlu0 %v3749_v32, %s3308_s12 }
 0xca8   : > { %1972 = vrot.lane.b32.xlu0 %v1968_v53, %s3308_s12 }
 0xd0e   : > { %v1848_v54 = vpop.xlane.xlu1 %1847 }
 0xd0f   : > { %v1845_v55 = vpop.xlane.xlu0 %1844  ;;  %v1850_v23 = vsub.f32 %v1842_v38, %v1848_v54 }
 0xd10   : > { %v1849_v56 = vsub.f32 %v1841_v39, %v1845_v55 }
 0xd11   : > { %v1853_v24 = vmul.f32 1.442695, %v1850_v23 }
 0xd12   : > { %v1851_v58 = vmul.f32 1.442695, %v1849_v56  ;;  %v1955_v63 = vpop.permute.xlu1 %1954 }
 0xd13   : > { %v1949_v1 = vpop.permute.xlu0 %1948 }
 0xd14   : > { %3208 = vpow2.f32 %v1851_v58  ;;  %v1959_v2 = vsel %vm404_vm1, %v1949_v1, %v1955_v63  ;;  %v3906_v63 = vld [vmem:[%s3558_s9 + $0x8] sm:$0xff] }
 0xd15   : > { %v1969_v3 = vmul.f32 %v3728_v25, %v1959_v2  ;;  %3210 = vpow2.f32 %v1853_v24  ;;  %v3910_v2 = vld [vmem:[%s3558_s9] sm:$0xff] }
 0xd16   : > { %v1479_v6 = vpop.permute.xlu1 %1478 }
 0xd17   : > { %v1477_v7 = vpop.permute.xlu0 %1476  ;;  %1974 = vrot.lane.b32.xlu1 %v1969_v3, %s3308_s12  ;;  %v1483_v11 = vmul.f32 %v3546_v59, %v1479_v6 }
 0xd18   : > { %v1482_v12 = vmul.f32 %v1477_v7, %v3548_v60 }
 0xd1a   : > { %v1491_v18 = vpop.permute.xlu1 %1490 }
 0xd1b   : > { %v1495_v5 = vadd.f32 %v1491_v18, %v1483_v11  ;;  %v1489_v13 = vpop.permute.xlu0 %1488 }
 0xd1c   : > { %v1494_v21 = vadd.f32 %v1489_v13, %v1482_v12 }
 0xd1e   : > { %v3209_v41 = vpop.eup %3208  ;;  %v3158_v20 = vpack.i.bf16 %v1495_v5, %v1494_v21  ;;  %v1963_v37 = vpop.permute.xlu1 %1962 }
 0xd1f   : > { %v1855_v22 = vsel %vm489_vm2, %v3209_v41, 0.0  ;;  %v3211_v29 = vpop.eup %3210  ;;  %v1961_v33 = vpop.permute.xlu0 %1960  ;;  %v1967_v38 = vmul.f32 %v3546_v59, %v1963_v37 }
 0xd20   : > { %1856 = vadd.xlane.f32.xlu0 %v1855_v22  ;;  %v1858_v31 = vsel %vm489_vm2, %v3211_v29, 0.0  ;;  %v1966_v16 = vmul.f32 %v1961_v33, %v3548_v60 }
 0xd23   : > { %v1973_v36 = vpop.permute.xlu0 %1972 }
 0xd24   : > { %v1978_v26 = vadd.f32 %v1973_v36, %v1966_v16 }
 0xd36   : > { %3159 = vrot.lane.b32.xlu0 %v3158_v20, %s4100_s14 }
 0xd3b   : > { %1859 = vadd.xlane.f32.xlu1 %v1858_v31 }
 0xd4c   : > { %1982 = vrot.lane.b32.xlu1 %v1978_v26, %s4101_s17 }
 0xd50   : > { %2194 = vrot.lane.b32.xlu1 %v3548_v60, %s4098_s19 }
 0xd89   : > { %v1975_v39 = vpop.permute.xlu1 %1974 }
 0xd8a   : > { %v1979_v15 = vadd.f32 %v1975_v39, %v1967_v38 }
 0xd8c   : > { %1984 = vrot.lane.b32.xlu0 %v1979_v15, %s4101_s17 }
 0xd90   : > { %2188 = vrot.lane.b32.xlu0 %v3686_v40, %s4102_s20 }
 0xdad   : > { %v1857_v57 = vpop.xlane.xlu0 %1856 }
 0xdae   : > { %3212 = vrcp.f32 %v1857_v57 }
 0xdb1   : > { %v3160_v42 = vpop.permute.xlu0 %3159 }
 0xdb2   : > { %v3162_v43 = vunpack.i.h.bf16 %v3160_v42  ;;  %v3161_v44 = vunpack.i.l.bf16 %v3160_v42 }
 0xdb4   : > { %v3889_v17 = vpack.c.bf16 %v3162_v43, %v3161_v44 }
 0xdb6   : > { %3040 = vmatprep.subr.msk.bf16.mxu1 %vm3524_vm3, %v3889_v17 }
 0xdb8   : > { %v3213_v62 = vpop.eup %3212 }
 0xdb9   : > { %v1862_v0 = vmul.f32 %v3213_v62, %v3209_v41 }
 0xdbb   : > { %2909 = vmatprep.mubr.msk.f32.mxu1 %vm489_vm2, %v1862_v0 }
 0xdc8   : > { %v1860_v49 = vpop.xlane.xlu1 %1859 }
 0xdc9   : > { %3214 = vrcp.f32 %v1860_v49 }
 0xdcc   : > { %v1983_v14 = vpop.permute.xlu1 %1982 }
 0xdd0   : > { %v2195_v12 = vpop.permute.xlu1 %2194 }
 0xdd3   : > { %v3215_v50 = vpop.eup %3214 }
 0xdd4   : > { %v1864_v40 = vmul.f32 %v3215_v50, %v3211_v29 }
 0xdd6   : > { %2910 = vmatmul.mubr.msk.f32.vlgmr.msra.gmra.mrb[10].mxu1 %vm489_vm2, %v1864_v40 }
 0xdd7   : > { %3043 = vmatpush3.bf16.xpose.msk.msra.mxu1 %vm3524_vm3, %v3889_v17  ;;  %2916 = vmatprep.mubr.msk.f32.mxu1 %vm489_vm2, %v1983_v14 }
 0xdfe   : > { %v1985_v51 = vpop.permute.xlu0 %1984 }
 0xdff   : > { %2917 = vmatmul.mubr.msk.f32.vlgmr.msra.gmra.mrb[12].mxu1 %vm489_vm2, %v1985_v51 }
 0xe02   : > { %v2189_v11 = vpop.permute.xlu0 %2188 }
 0xe03   : > { %v2200_v18 = vsel %vm404_vm1, %v2189_v11, %v2195_v12 }
 0xe04   : > { %v2210_v5 = vmul.f32 %v3743_v30, %v2200_v18  ;;  %v2445_v18 = vld [vmem:[%s4076_s2 + $0x8] sm:$0xff] }
 0xea9   : > { %v3901_v52 = vpop.f32.mrb[10].mxu1 }
 0xeaa   : > { %v3903_v53 = vpop.f32.mrb[11].mxu1 }
 0xed2   : > { %v2918_v54 = vpop.f32.mrb[12].mxu1 }
 0xed3   : > { %v2076_v55 = vmul.f32 0.25, %v2918_v54  ;;  %v2066_v56 = vpop.f32.mrb[13].mxu1 }
 0xed4   : > { %v2075_v58 = vmul.f32 0.25, %v2066_v56 }
 0xed5   : > { %v2078_v1 = vadd.f32 %v3906_v63, %v2076_v55 }
 0xed6   : > { %v2077_v3 = vadd.f32 %v3910_v2, %v2075_v58 }
 0xed7   : > { %v2082_v6 = vsel %vm489_vm2, %v2078_v1, -inf }
 0xed8   : > { %2083 = vmax.xlane.f32.xlu0 %v2082_v6  ;;  %v2079_v7 = vsel %vm489_vm2, %v2077_v3, -inf }
 0xed9   : > { %2080 = vmax.xlane.f32.xlu1 %v2079_v7 }
 0xeea   : > { %2190 = vrot.lane.b32.xlu1 %v3695_v48, %s4102_s20  ;;  %s3238_s20 = sshll.u32 %s3312_s25, 4  ;;  %s3239_s20 = int_to_ptr.vmem [resolvable:$false] %s3238_s20 }
 0xeeb   : > { %s3240_s9 = scalar_lea.vmem %s3239_s20, 1024 }
 0xeee   : > { %2196 = vrot.lane.b32.xlu0 %v3546_v59, %s4098_s19  ;;  %2202 = vrot.lane.b32.xlu1 %v3749_v32, %s4100_s14 }
 0xef2   : > { %2214 = vrot.lane.b32.xlu1 %v2210_v5, %s4100_s14  ;;  %2204 = vrot.lane.b32.xlu0 %v3734_v19, %s4100_s14 }
 0xf65   : > { %v2084_v13 = vpop.xlane.xlu0 %2083 }
 0xf66   : > { %v2081_v21 = vpop.xlane.xlu1 %2080  ;;  %v2086_v29 = vsub.f32 %v2078_v1, %v2084_v13 }
 0xf67   : > { %v2085_v19 = vsub.f32 %v2077_v3, %v2081_v21 }
 0xf68   : > { %v2089_v31 = vmul.f32 1.442695, %v2086_v29 }
 0xf69   : > { %v2197_v41 = vpop.permute.xlu0 %2196  ;;  %v2087_v33 = vmul.f32 1.442695, %v2085_v19  ;;  %v2448_v19 = vld [vmem:[%s4076_s2 + $0x20] sm:$0xff] }
 0xf6a   : > { %v2191_v48 = vpop.permute.xlu1 %2190  ;;  %3216 = vpow2.f32 %v2089_v31 }
 0xf6b   : > { %v2201_v20 = vsel %vm404_vm1, %v2191_v48, %v2197_v41  ;;  %3218 = vpow2.f32 %v2087_v33  ;;  %v2449_v33 = vld [vmem:[%s4076_s2 + $0x28] sm:$0xff] }
 0xf6c   : > { %v2211_v22 = vmul.f32 %v3728_v25, %v2201_v20 }
 0xf6e   : > { %2216 = vrot.lane.b32.xlu0 %v2211_v22, %s4100_s14  ;;  %v2203_v23 = vpop.permute.xlu1 %2202  ;;  %v2446_v22 = vld [vmem:[%s4076_s2 + $0x10] sm:$0xff] }
 0xf6f   : > { %v2208_v32 = vmul.f32 %v2203_v23, %v3548_v60  ;;  %v2205_v60 = vpop.permute.xlu0 %2204 }
 0xf70   : > { %v2209_v37 = vmul.f32 %v3546_v59, %v2205_v60 }
 0xf72   : > { %v2215_v24 = vpop.permute.xlu1 %2214 }
 0xf73   : > { %v2220_v30 = vadd.f32 %v2215_v24, %v2208_v32 }
 0xf74   : > { %v3217_v36 = vpop.eup %3216 }
 0xf75   : > { %2224 = vrot.lane.b32.xlu1 %v2220_v30, %s4099_s13  ;;  %v2094_v16 = vsel %vm489_vm2, %v3217_v36, 0.0  ;;  %v3219_v25 = vpop.eup %3218 }
 0xf76   : > { %v2091_v26 = vsel %vm489_vm2, %v3219_v25, 0.0 }
 0xf8d   : > { %2095 = vadd.xlane.f32.xlu0 %v2094_v16  ;;  %v2450_v16 = vld [vmem:[%s4076_s2 + $0x30] sm:$0xff] }
 0xf99   : > { %2092 = vadd.xlane.f32.xlu1 %v2091_v26 }
 0xfa3   : > { %3164 = vrot.lane.b32.xlu0 %v3552_v61, %s3307_s11 }
 0xfe0   : > { %v2217_v38 = vpop.permute.xlu0 %2216 }
 0xfe1   : > { %v2221_v39 = vadd.f32 %v2217_v38, %v2209_v37 }
 0xfe3   : > { %2226 = vrot.lane.b32.xlu1 %v2221_v39, %s4099_s13  ;;  %s4032_s13 = scalar_lea.sflag [#allocation3], %s257_s28 }
 0xfe7   : > { %v2225_v62 = vpop.permute.xlu1 %2224 }
0x101a   : > { %v2096_v15 = vpop.xlane.xlu0 %2095 }
0x101b   : > { %3220 = vrcp.f32 %v2096_v15 }
0x101e   : > { %v3165_v57 = vpop.permute.xlu0 %3164 }
0x101f   : > { %v3167_v42 = vunpack.i.h.bf16 %v3165_v57  ;;  %v3166_v43 = vunpack.i.l.bf16 %v3165_v57 }
0x1021   : > { %v3044_v44 = vpack.c.bf16 %v3167_v42, %v3166_v43 }
0x1023   : > { %3045 = vmatprep.subr.bf16.mxu0 %v3044_v44  ;;  %3055 = vmatprep.subr.bf16.mxu1 %v3044_v44 }
0x1024   : > { %3047 = vmatpush3.bf16.msra.mxu0 %v3044_v44  ;;  %3057 = vmatpush3.bf16.msra.mxu1 %v3044_v44 }
0x1025   : > { %3050 = vmatprep.subr.msk.bf16.mxu0 %vm3524_vm3, %v3889_v17  ;;  %v3221_v61 = vpop.eup %3220 }
0x1026   : > { %v2093_v59 = vpop.xlane.xlu1 %2092  ;;  %v2100_v50 = vmul.f32 %v3221_v61, %v3217_v36 }
0x1027   : > { %3222 = vrcp.f32 %v2093_v59 }
0x1031   : > { %v3223_v0 = vpop.eup %3222 }
0x1032   : > { %v2098_v49 = vmul.f32 %v3223_v0, %v3219_v25  ;;  %v2451_v25 = vld [vmem:[%s4076_s2 + $0x38] sm:$0xff] }
0x1033   : > { %v3070_v26 = vpack.c.bf16 %v2451_v25, %v2450_v16 }
0x1034   : > { %2923 = vmatprep.mubr.msk.f32.mxu0 %vm489_vm2, %v2098_v49 }
0x1035   : > { %2924 = vmatmul.mubr.msk.f32.vlgmr.msra.gmra.mrb[16].mxu0 %vm489_vm2, %v2100_v50 }
0x1036   : > { %3053 = vmatpush3.bf16.xpose.msk.msra.mxu0 %vm3524_vm3, %v3889_v17  ;;  %2930 = vmatprep.mubr.msk.f32.mxu0 %vm489_vm2, %v2225_v62 }
0x1055   : > { %v2227_v40 = vpop.permute.xlu1 %2226 }
0x1056   : > { %2931 = vmatmul.mubr.msk.f32.vlgmr.msra.gmra.mrb[18].mxu0 %vm489_vm2, %v2227_v40 }
0x1108   : > { %v2925_v14 = vpop.f32.mrb[16].mxu0 }
0x1109   : > { %v2179_v51 = vpop.f32.mrb[17].mxu0 }
0x1129   : > { %v2932_v54 = vpop.f32.mrb[18].mxu0 }
0x112a   : > { %v2308_v55 = vmul.f32 0.25, %v2932_v54  ;;  %v2298_v56 = vpop.f32.mrb[19].mxu0 }
0x112b   : > { %v2307_v58 = vmul.f32 0.25, %v2298_v56 }
0x112c   : > { %v2310_v1 = vadd.f32 %v3906_v63, %v2308_v55 }
0x112d   : > { %v2309_v3 = vadd.f32 %v3910_v2, %v2307_v58 }
0x112e   : > { %v2314_v6 = vsel %vm489_vm2, %v2310_v1, -inf }
0x112f   : > { %2315 = vmax.xlane.f32.xlu1 %v2314_v6  ;;  %v2311_v46 = vsel %vm489_vm2, %v2309_v3, -inf }
0x1130   : > { %2312 = vmax.xlane.f32.xlu0 %v2311_v46 }
0x1140   : > { %1384 = vrot.lane.b32.xlu1 %v3715_v8, %s3307_s11 }
0x1144   : > { %1392 = vrot.lane.b32.xlu1 %v3719_v10, %s3308_s12 }
0x1148   : > { %1394 = vrot.lane.b32.xlu1 %v3717_v9, %s3308_s12 }
0x114c   : > { %1402 = vrot.lane.b32.xlu1 %v3792_v27, %s4100_s14 }
0x1150   : > { %2418 = vrot.lane.b32.xlu1 %v3901_v52, %s3307_s11  ;;  %v2444_v52 = vld [vmem:[%s4076_s2] sm:$0xff] }
0x1151   : > { %v3058_v5 = vpack.c.bf16 %v2445_v18, %v2444_v52 }
0x1153   : > { %3059 = vmatprep.subr.bf16.mxu1 %v3058_v5 }
0x1154   : > { %2426 = vrot.lane.b32.xlu1 %v2925_v14, %s3308_s12 }
0x11bc   : > { %v2316_v17 = vpop.xlane.xlu1 %2315 }
0x11bd   : > { %v2318_v63 = vsub.f32 %v2310_v1, %v2316_v17  ;;  %v2313_v2 = vpop.xlane.xlu0 %2312 }
0x11be   : > { %v2317_v7 = vsub.f32 %v2309_v3, %v2313_v2 }
0x11bf   : > { %v2321_v11 = vmul.f32 1.442695, %v2318_v63 }
0x11c0   : > { %v2319_v8 = vmul.f32 1.442695, %v2317_v7  ;;  %v1385_v21 = vpop.permute.xlu1 %1384 }
0x11c1   : > { %v1406_v24 = vsel %vm489_vm2, %v3653_v45, %v1385_v21  ;;  %v3066_v45 = vpack.c.bf16 %v2449_v33, %v2448_v19 }
0x11c2   : > { %3224 = vpow2.f32 %v2319_v8 }
0x11c3   : > { %3226 = vpow2.f32 %v2321_v11 }
0x11cc   : > { %v3225_v10 = vpop.eup %3224 }
0x11cd   : > { %v2323_v12 = vsel %vm489_vm2, %v3225_v10, 0.0  ;;  %v3227_v9 = vpop.eup %3226 }
0x11ce   : > { %2324 = vadd.xlane.f32.xlu0 %v2323_v12  ;;  %v2326_v27 = vsel %vm489_vm2, %v3227_v9, 0.0 }
0x11d2   : > { %2327 = vadd.xlane.f32.xlu0 %v2326_v27 }
0x11e8   : > { %1386 = vrot.lane.b32.xlu0 %v3713_v4, %s3307_s11 }
0x11ec   : > { %1400 = vrot.lane.b32.xlu0 %v3794_v28, %s4100_s14  ;;  %v2447_v28 = vld [vmem:[%s4076_s2 + $0x18] sm:$0xff] }
0x11ed   : > { %v3062_v29 = vpack.c.bf16 %v2447_v28, %v2446_v22 }
0x11f0   : > { %2416 = vrot.lane.b32.xlu0 %v3903_v53, %s3307_s11  ;;  %v1393_v53 = vpop.permute.xlu1 %1392 }
0x11f1   : > { %v1409_v31 = vsel %vm1408_vm4, %v1406_v24, %v1393_v53 }
0x11f4   : > { %2424 = vrot.lane.b32.xlu0 %v2179_v51, %s3308_s12  ;;  %v1395_v60 = vpop.permute.xlu1 %1394  ;;  %s4028_s12 = scalar_lea.hbm %s4080_s6, %s2717_s16 }
0x11f8   : > { %v1403_v39 = vpop.permute.xlu1 %1402 }
0x11fc   : > { %v2419_v44 = vpop.permute.xlu1 %2418 }
0x11fd   : > { %v2439_v50 = vsel %vm489_vm2, %v3844_v34, %v2419_v44 }
0x1200   : > { %v2427_v59 = vpop.permute.xlu1 %2426 }
0x1201   : > { %v2441_v51 = vsel %vm1408_vm4, %v2439_v50, %v2427_v59 }
0x125b   : > { %v2325_v13 = vpop.xlane.xlu0 %2324 }
0x125c   : > { %3228 = vrcp.f32 %v2325_v13 }
0x125f   : > { %v2328_v4 = vpop.xlane.xlu0 %2327 }
0x1260   : > { %3230 = vrcp.f32 %v2328_v4 }
0x1263   : > { %v1387_v41 = vpop.permute.xlu0 %1386 }
0x1264   : > { %v1407_v37 = vsel %vm489_vm2, %v3651_v47, %v1387_v41 }
0x1265   : > { %v1410_v38 = vsel %vm1408_vm4, %v1407_v37, %v1395_v60 }
0x1266   : > { %v3229_v48 = vpop.eup %3228  ;;  %v1413_v15 = vsel %vm1411_vm5, %v1410_v38, %v1403_v39 }
0x1267   : > { %v2330_v20 = vmul.f32 %v3229_v48, %v3225_v10  ;;  %v1401_v32 = vpop.permute.xlu0 %1400 }
0x1268   : > { %v1412_v36 = vsel %vm1411_vm5, %v1409_v31, %v1401_v32 }
0x1269   : > { %2937 = vmatprep.mubr.msk.f32.mxu1 %vm489_vm2, %v2330_v20 }
0x126a   : > { %v3231_v23 = vpop.eup %3230 }
0x126b   : > { %v2332_v30 = vmul.f32 %v3231_v23, %v3227_v9  ;;  %v2417_v62 = vpop.permute.xlu0 %2416 }
0x126c   : > { %v2438_v0 = vsel %vm489_vm2, %v3846_v35, %v2417_v62 }
0x126d   : > { %2938 = vmatmul.mubr.msk.f32.vlgmr.msra.gmra.mrb[14].mxu1 %vm489_vm2, %v2332_v30 }
0x126e   : > { %3061 = vmatpush3.bf16.msra.mxu1 %v3058_v5  ;;  %2956 = vmatprep.mubr.msk.f32.mxu1 %vm282_vm0, %v1412_v36 }
0x126f   : > { %3063 = vmatprep.subr.bf16.mxu1 %v3062_v29  ;;  %v2425_v61 = vpop.permute.xlu0 %2424 }
0x1270   : > { %v2440_v40 = vsel %vm1408_vm4, %v2438_v0, %v2425_v61 }
0x1272   : > { %3065 = vmatpush3.bf16.msra.mxu1 %v3062_v29 }
0x1273   : > { %3067 = vmatprep.subr.bf16.mxu1 %v3066_v45 }
0x1276   : > { %3069 = vmatpush3.bf16.msra.mxu1 %v3066_v45 }
0x1277   : > { %3071 = vmatprep.subr.bf16.mxu1 %v3070_v26 }
0x127a   : > { %3073 = vmatpush3.bf16.msra.mxu1 %v3070_v26 }
0x127d   : > { %2957 = vmatmul.mubr.msk.f32.vlgmr.msra.gmra.mrb[16].mxu1 %vm282_vm0, %v1413_v15 }
0x1340   : > { %v2939_v57 = vpop.f32.mrb[14].mxu1 }
0x1341   : > { %2434 = vrot.lane.b32.xlu1 %v2939_v57, %s4100_s14  ;;  %v2405_v42 = vpop.f32.mrb[15].mxu1 }
0x1342   : > { %2432 = vrot.lane.b32.xlu0 %v2405_v42, %s4100_s14  ;;  %s2567_s14 = sshll.u32 %s259_s29, 4  ;;  %s4023_s14 = int_to_ptr.vmem [resolvable:$true] %s2567_s14 }
0x1343   : > { %s3234_s17 = scalar_lea.vmem %s4023_s14, 512  ;;  %p3241_p0 = scmp.lt.s32.totalorder %s4023_s14, %s3239_s20 }
0x1344   : > { %p3235_p11 = scmp.ne.s32.totalorder %s4023_s14, %s3234_s17  ;;  %p3242_p1 = scmp.lt.s32.totalorder %s3240_s9, %s3234_s17 }
0x1346   : > { %p3236_p12 = pnand %p3235_p11, %p3387_p5  ;;  %p3243_p2 = por %p3242_p1, %p3241_p0 }
0x1348   : > { %p3237_p13 = pneg %p3236_p12 }
0x134a   : > { %p3244_p3 = pnand %p3243_p2, %p3237_p13 }
0x1350   : > { %v2958_v43 = vpop.f32.mrb[16].mxu1 }
0x1351   : > { %2550 = vst.msk [vmem:[%s259_s29 + $0x8] sm:$0xff] %vm282_vm0, %v2958_v43  ;;  %v2530_v47 = vpop.f32.mrb[17].mxu1 }
0x1352   : > { %2549 = vst.msk [vmem:[%s259_s29] sm:$0xff] %vm282_vm0, %v2530_v47 }
0x13b3   : > { %v2435_v49 = vpop.permute.xlu1 %2434 }
0x13b4   : > { %v2433_v14 = vpop.permute.xlu0 %2432  ;;  %v2443_v55 = vsel %vm1411_vm5, %v2441_v51, %v2435_v49 }
0x13b5   : > { %v2442_v54 = vsel %vm1411_vm5, %v2440_v40, %v2433_v14 }
0x13b6   : > { %2959 = vmatprep.mubr.msk.f32.mxu1 %vm282_vm0, %v2442_v54 }
0x13b7   : > { %2960 = vmatmul.mubr.msk.f32.gmra.mrb[18].mxu1 %vm282_vm0, %v2443_v55 }
0x148a   : > { %v2961_v34 = vpop.f32.mrb[18].mxu1 }
0x148b   : > { %2552 = vst.msk [vmem:[%s259_s29 + $0x18] sm:$0xff] %vm282_vm0, %v2961_v34  ;;  %v2540_v35 = vpop.f32.mrb[19].mxu1 }
0x148c   : > { %2551 = vst.msk [vmem:[%s259_s29 + $0x10] sm:$0xff] %vm282_vm0, %v2540_v35 }
0x148d   : > { %3247 = shalt.err (!%p3244_p3)
}
0x148e   : > { %s3248_s26 = scalar_lea.hbm %s4028_s12, 512  ;;  %s3252_s15 = scalar_lea.hbm %s4080_s6, 1024 }
0x148f   : > { %p3249_p4 = scmp.ne.s32.totalorder %s4028_s12, %s3248_s26  ;;  %p3253_p9 = scmp.lt.u32.totalorder %s4028_s12, %s4080_s6 }
0x1490   : > { %p3254_p10 = scmp.lt.u32.totalorder %s3252_s15, %s3248_s26  ;;  %p3256_p12 = scmp.lt.u32.totalorder %s3248_s26, %s4028_s12 }
0x1491   : > { %p3250_p7 = pnand %p3249_p4, %p3387_p5 }
0x1492   : > { %p3255_p11 = por %p3254_p10, %p3253_p9 }
0x1493   : > { %p3251_p8 = pneg %p3250_p7 }
0x1494   : > { %p3257_p13 = por %p3256_p12, %p3255_p11 }
0x1496   : > { %p3258_p0 = pnand %p3257_p13, %p3251_p8 }
0x1498   : > { %3261 = shalt.err (!%p3258_p0)
}
0x1499   : > { %s3313_s19 = smov 128  }
0x149a   : > { %3074 = dma.vmem_to_hbm [thread:$0]  (%p3387_p5), %s4023_s14, 512, %s4028_s12, %s4032_s13, %s3313_s19, %s3313_s19, %s3304_s18  }
0x149b PF: > { %p3080_p1 = scmp.ge.s32.totalorder %s3296_s24, 2  ;;  %s2582_s11 = sand.u32 1, %s3284_s21  }
0x149c   : > { %s2583_s17 = scalar_lea.sflag [#allocation3], %s2582_s11 }
0x149d   : > { %p3077_p2 = pnand %p3080_p1, %p3391_p6 }
0x149f   : > { %3279 = dma.done.wait (!%p3077_p2), %s2583_s17, 512  }
0x14a0   : > { %3281 = vsyncadd (!%p3077_p2), %s2583_s17, 4294966784  ;;  %p16_p3 = scmp.ge.s32.totalorder %s3374_s27, 4   ;;  %s4103_s21 = smov %s3288_s22 }
0x14a1   : > { %s4104_s22 = smov %s3292_s23  ;;  %s4105_s23 = smov %s3385_s30 }
0x14a2   : > { %s4106_s24 = smov %s3374_s27  ;;  %18 = sbr.rel (!%p16_p3) target bundleno = 3 (0x3), region = 84 }
0x14a9   :  { %2588 = vsyncpa [#allocation3], 1 }
0x14aa   :  { %2590 = vsyncpa [#allocation3 + $0x1], 1 }

</bundles_post_ra>
